<compile_context>
chip_gen: v7x
topology: tpu7x:2x2x1
jax: 0.10.0
libtpu: 0.0.40
codegen_flags: <defaults>
</compile_context>

<pallas_src>
import math
from functools import partial

import jax
import jax.numpy as jnp
from jax import lax
from jax.experimental import pallas as pl
from jax.experimental.pallas import tpu as pltpu


def _mha_kernel(q_ref, k_ref, v_ref, mask_ref,
                wq_ref, bq_ref, wk_ref, bk_ref, wv_ref, bv_ref,
                wo_ref, bo_ref, gamma_ref, beta_ref,
                out_ref, *, num_heads, len_vec, eps):
    blk_b, S, E = q_ref.shape
    HV = num_heads * len_vec
    M = blk_b * S

    # Flatten batch*seq into MXU rows (leading-dim merge only, lane dim unchanged).
    q2 = q_ref[...].reshape(M, E)            # also the residual
    k2 = k_ref[...].reshape(M, E)
    v2 = v_ref[...].reshape(M, E)

    def proj(x2, w_ref, b_ref):
        # bf16 operands on the MXU, fp32 accumulation.
        return jnp.dot(x2.astype(jnp.bfloat16), w_ref[...],
                       preferred_element_type=jnp.float32) + b_ref[...]

    scale = 1.0 / math.sqrt(len_vec)
    # Fold the 1/sqrt(Dh) softmax scale into Q once (one pass over (M,HV)).
    # TODO(synk): when Q is K is V (self-attention), fuse W_Q/W_K/W_V into one
    # (E, 3*HV) weight and do a single (M,E)@(E,3HV) matmul; the module accepts
    # distinct Q/K/V inputs so that fusion is not applied here.
    Qs = (proj(q2, wq_ref, bq_ref) * scale).reshape(blk_b, S, HV)
    Ks = proj(k2, wk_ref, bk_ref).reshape(blk_b, S, HV)
    Vs = proj(v2, wv_ref, bv_ref).reshape(blk_b, S, HV)

    # Additive mask bias, hoisted out of the head loop (all heads share it).
    # Mask arrives as int8 in {0,1}; -1e30 keeps fully-masked rows finite
    # (uniform attention) instead of the reference's NaN for degenerate rows.
    mask_bias = mask_ref[...].astype(jnp.float32) * jnp.float32(-1e30)

    wo_all = wo_ref[...]                     # (HV, E) bf16, loaded once

    # Per-head attention with the output projection folded in:
    #   y += softmax(q_h k_h^T * scale + bias) v_h @ W_o[h]
    # No lane-dim concatenate; per-head fp32 context dies right after use.
    # TODO(synk): at production head dims (Dh a multiple of 128) replace the
    # static head loop with a single (b,h)-batched dot_general on a head-major
    # layout; at Dh=8 the score/context matmuls are not MXU-bound anyway.
    # TODO(synk): for large S switch this block to a KV-tiled online-softmax
    # loop so only (tq, tk) score tiles stay live (mandatory on v7x's 64 MiB).
    y = jnp.zeros((M, E), jnp.float32)
    for h in range(num_heads):
        lo = h * len_vec
        qh = Qs[:, :, lo:lo + len_vec].astype(jnp.bfloat16)   # (blk_b, S, Dh)
        kh = Ks[:, :, lo:lo + len_vec].astype(jnp.bfloat16)
        vh = Vs[:, :, lo:lo + len_vec].astype(jnp.bfloat16)

        # No explicit K transpose: contract on the last dim of both operands.
        scores = jnp.einsum('bqd,bkd->bqk', qh, kh,
                            preferred_element_type=jnp.float32) + mask_bias
        m = jnp.max(scores, axis=-1, keepdims=True)
        e = jnp.exp(scores - m)
        denom = jnp.sum(e, axis=-1, keepdims=True)
        attn = (e * pl.reciprocal(denom, approx=True)).astype(jnp.bfloat16)

        ctx_h = jnp.einsum('bqk,bkd->bqd', attn, vh,
                           preferred_element_type=jnp.float32)
        y = y + jnp.dot(ctx_h.reshape(M, len_vec).astype(jnp.bfloat16),
                        wo_all[lo:lo + len_vec, :],
                        preferred_element_type=jnp.float32)

    # fc bias + residual + two-pass LayerNorm (centered variance avoids the
    # catastrophic cancellation of the one-pass E[z^2] - mean^2 form).
    z = y + bo_ref[...] + q2
    mean = jnp.mean(z, axis=-1, keepdims=True)
    zc = z - mean
    var = jnp.mean(zc * zc, axis=-1, keepdims=True)
    out = zc * lax.rsqrt(var + eps) * gamma_ref[...] + beta_ref[...]

    # out_ref is either the lane-dense (blk_b, S*E/128, 128) slab or the plain
    # (blk_b, S, E) block; both are the row-major layout of `out`.
    out_ref[...] = out.reshape(out_ref.shape)


def prepare_params(params):
    """One-time prep outside the call path: matmul weights -> bf16 (half the
    weight DMA bytes, 2x MXU rate); biases / LayerNorm params stay fp32."""
    prepared = dict(params)
    for name in ("wq", "wk", "wv", "wo"):
        prepared[name] = params[name].astype(jnp.bfloat16)
    return prepared


def multi_head_attention(Q, K, V, attention_mask, params, *,
                         num_heads, len_vec, eps=1e-5, block_b=None):
    """Q, K, V: (B, S, E) float32; attention_mask: (B, S, S), nonzero == masked.
    `params` should come from prepare_params (bf16 weights)."""
    B, S, E = Q.shape
    HV = num_heads * len_vec
    if block_b is None:
        # >= 2 grid steps so the pipeline overlaps DMA with compute and the
        # parallel axis can shard across v7x's 2 TensorCores; aim for 4 steps.
        block_b = max(1, B // 4)
    assert B % block_b == 0, "block_b must divide batch"
    n_blocks = B // block_b

    # The only O(S^2) HBM term: ship it as int8 (4x less traffic than int32),
    # normalized to {0,1} so the kernel builds the bias with one multiply.
    mask_i8 = (attention_mask != 0).astype(jnp.int8)

    kernel = partial(_mha_kernel, num_heads=num_heads, len_vec=len_vec, eps=eps)
    blk = lambda b: (b, 0, 0)
    full = lambda b: (0, 0)

    def run(out_shape, out_spec):
        return pl.pallas_call(
            kernel,
            out_shape=jax.ShapeDtypeStruct(out_shape, jnp.float32),
            grid_spec=pltpu.PrefetchScalarGridSpec(
                num_scalar_prefetch=0,
                grid=(n_blocks,),
                in_specs=[
                    pl.BlockSpec((block_b, S, E), blk),    # Q
                    pl.BlockSpec((block_b, S, E), blk),    # K
                    pl.BlockSpec((block_b, S, E), blk),    # V
                    pl.BlockSpec((block_b, S, S), blk),    # mask (int8)
                    pl.BlockSpec((E, HV), full),           # W_Q (bf16)
                    pl.BlockSpec((1, HV), full),           # b_Q
                    pl.BlockSpec((E, HV), full),           # W_K (bf16)
                    pl.BlockSpec((1, HV), full),           # b_K
                    pl.BlockSpec((E, HV), full),           # W_V (bf16)
                    pl.BlockSpec((1, HV), full),           # b_V
                    pl.BlockSpec((HV, E), full),           # fc W (bf16)
                    pl.BlockSpec((1, E), full),            # fc b
                    pl.BlockSpec((1, E), full),            # LN gamma
                    pl.BlockSpec((1, E), full),            # LN beta
                ],
                out_specs=out_spec,
            ),
            compiler_params=pltpu.CompilerParams(
                dimension_semantics=("parallel",),
                # Above v5e/v6e's 16/32 MiB scoped defaults (large resident
                # tiles are free on 128 MiB parts), below v7x's 64 MiB VMEM.
                vmem_limit_bytes=48 * 1024 * 1024),
        )(Q, K, V, mask_i8,
          params["wq"], params["bq"], params["wk"], params["bk"],
          params["wv"], params["bv"], params["wo"], params["bo"],
          params["gamma"], params["beta"])

    # Lane-dense output slab (last dim 128): full-width vst instead of masked
    # 32-lane vst.msk — the biggest store-side lever for sub-128-lane outputs.
    if (S * E) % 128 == 0:
        cols = (S * E) // 128
        try:
            out = run((B, cols, 128), pl.BlockSpec((block_b, cols, 128), blk))
            out = jax.block_until_ready(out)   # surface any deferred error here
            return out.reshape(B, S, E)        # free row-major reshape outside
        except Exception:
            # TODO(synk): this Mosaic build can't lower the in-kernel
            # lane-merge reshape; fall back to the plain (B, S, E) layout.
            pass
    return run((B, S, E), pl.BlockSpec((block_b, S, E), blk))


def _reference(Q, K, V, mask, params, *, num_heads, len_vec, eps=1e-5):
    """Pure-JAX fp32 reference mirroring the PyTorch forward."""
    B, S, E = Q.shape

    def proj(x, w, b):
        return x @ w + b[0]

    Qs = proj(Q, params["wq"], params["bq"]).reshape(B, S, num_heads, len_vec).transpose(0, 2, 1, 3)
    Ks = proj(K, params["wk"], params["bk"]).reshape(B, S, num_heads, len_vec).transpose(0, 2, 1, 3)
    Vs = proj(V, params["wv"], params["bv"]).reshape(B, S, num_heads, len_vec).transpose(0, 2, 1, 3)
    m = (mask[:, None, :, :] > 0)
    scores = jnp.einsum("bhqd,bhkd->bhqk", Qs, Ks) / math.sqrt(len_vec)
    scores = jnp.where(m, -jnp.inf, scores)
    attn = jax.nn.softmax(scores, axis=-1)
    ctx = jnp.einsum("bhqk,bhkd->bhqd", attn, Vs)
    ctx = ctx.transpose(0, 2, 1, 3).reshape(B, S, num_heads * len_vec)
    y = ctx @ params["wo"] + params["bo"][0]
    z = y + Q
    mean = jnp.mean(z, -1, keepdims=True)
    var = jnp.mean((z - mean) ** 2, -1, keepdims=True)
    return (z - mean) / jnp.sqrt(var + eps) * params["gamma"][0] + params["beta"][0]


if __name__ == "__main__":
    # Small shapes consistent with the module; B=4 -> grid=(4,) with block_b=1
    # (pipelined DMA/compute overlap, and >=2 parallel steps for v7x's 2 TCs).
    B, S, E = 4, 8, 32
    num_heads = 4
    len_vec = E // num_heads          # 8
    HV = num_heads * len_vec

    key = jax.random.PRNGKey(0)
    keys = jax.random.split(key, 12)

    # Deterministic parameter init (weights stored as (in, out) == W.T of nn.Linear).
    s = 0.1
    params_f32 = {
        "wq": s * jax.random.normal(keys[0], (E, HV), jnp.float32),
        "bq": s * jax.random.normal(keys[1], (1, HV), jnp.float32),
        "wk": s * jax.random.normal(keys[2], (E, HV), jnp.float32),
        "bk": s * jax.random.normal(keys[3], (1, HV), jnp.float32),
        "wv": s * jax.random.normal(keys[4], (E, HV), jnp.float32),
        "bv": s * jax.random.normal(keys[5], (1, HV), jnp.float32),
        "wo": s * jax.random.normal(keys[6], (HV, E), jnp.float32),
        "bo": s * jax.random.normal(keys[7], (1, E), jnp.float32),
        "gamma": jnp.ones((1, E), jnp.float32),
        "beta": jnp.zeros((1, E), jnp.float32),
    }
    params_dev = prepare_params(params_f32)   # bf16 weights, cast ONCE, outside the call path

    Q = jax.random.normal(keys[8], (B, S, E), jnp.float32)
    K = jax.random.normal(keys[9], (B, S, E), jnp.float32)
    V = jax.random.normal(keys[10], (B, S, E), jnp.float32)

    # Padding-style mask: last 2 key positions are masked for every query.
    key_valid = jnp.arange(S) < (S - 2)
    attention_mask = jnp.broadcast_to((~key_valid)[None, None, :], (B, S, S)).astype(jnp.int32)

    out = multi_head_attention(Q, K, V, attention_mask, params_dev,
                               num_heads=num_heads, len_vec=len_vec)
    out = jax.block_until_ready(out)

    ref = _reference(Q, K, V, attention_mask, params_f32,
                     num_heads=num_heads, len_vec=len_vec)
    assert out.shape == (B, S, E)
    # bf16 MXU operands + approx reciprocal => compare with a modest tolerance.
    assert jnp.allclose(out, ref, atol=2e-2, rtol=2e-2), "mismatch vs reference"

    print("KERNEL_OK")
</pallas_src>

<mosaic_0001>
module attributes {stable_mosaic.version = 11 : i64} {
  func.func @_mha_kernel(%arg0: i32, %arg1: memref<1x8x32xf32, #tpu.memory_space<vmem>>, %arg2: memref<1x8x32xf32, #tpu.memory_space<vmem>>, %arg3: memref<1x8x32xf32, #tpu.memory_space<vmem>>, %arg4: memref<1x8x8xi8, #tpu.memory_space<vmem>>, %arg5: memref<32x32xbf16, #tpu.memory_space<vmem>>, %arg6: memref<1x32xf32, #tpu.memory_space<vmem>>, %arg7: memref<32x32xbf16, #tpu.memory_space<vmem>>, %arg8: memref<1x32xf32, #tpu.memory_space<vmem>>, %arg9: memref<32x32xbf16, #tpu.memory_space<vmem>>, %arg10: memref<1x32xf32, #tpu.memory_space<vmem>>, %arg11: memref<32x32xbf16, #tpu.memory_space<vmem>>, %arg12: memref<1x32xf32, #tpu.memory_space<vmem>>, %arg13: memref<1x32xf32, #tpu.memory_space<vmem>>, %arg14: memref<1x32xf32, #tpu.memory_space<vmem>>, %arg15: memref<1x2x128xf32, #tpu.memory_space<vmem>>) attributes {dimension_semantics = [#tpu.dimension_semantics<parallel>], iteration_bounds = array<i64: 4>, scalar_prefetch = 0 : i64, scratch_operands = 0 : i64, tpu.core_type = #tpu.core_type<tc>, window_params = [{transform_indices = @transform_0, window_bounds = array<i64: 1, 8, 32>}, {transform_indices = @transform_1, window_bounds = array<i64: 1, 8, 32>}, {transform_indices = @transform_2, window_bounds = array<i64: 1, 8, 32>}, {transform_indices = @transform_3, window_bounds = array<i64: 1, 8, 8>}, {pipeline_mode = #tpu.pipeline_mode<synchronous>, transform_indices = @transform_4, window_bounds = array<i64: 32, 32>}, {pipeline_mode = #tpu.pipeline_mode<synchronous>, transform_indices = @transform_5, window_bounds = array<i64: 1, 32>}, {pipeline_mode = #tpu.pipeline_mode<synchronous>, transform_indices = @transform_6, window_bounds = array<i64: 32, 32>}, {pipeline_mode = #tpu.pipeline_mode<synchronous>, transform_indices = @transform_7, window_bounds = array<i64: 1, 32>}, {pipeline_mode = #tpu.pipeline_mode<synchronous>, transform_indices = @transform_8, window_bounds = array<i64: 32, 32>}, {pipeline_mode = #tpu.pipeline_mode<synchronous>, transform_indices = @transform_9, window_bounds = array<i64: 1, 32>}, {pipeline_mode = #tpu.pipeline_mode<synchronous>, transform_indices = @transform_10, window_bounds = array<i64: 32, 32>}, {pipeline_mode = #tpu.pipeline_mode<synchronous>, transform_indices = @transform_11, window_bounds = array<i64: 1, 32>}, {pipeline_mode = #tpu.pipeline_mode<synchronous>, transform_indices = @transform_12, window_bounds = array<i64: 1, 32>}, {pipeline_mode = #tpu.pipeline_mode<synchronous>, transform_indices = @transform_13, window_bounds = array<i64: 1, 32>}, {transform_indices = @transform_14, window_bounds = array<i64: 1, 2, 128>}]} {
    %c0 = arith.constant 0 : index
    %c0_0 = arith.constant 0 : index
    %c0_1 = arith.constant 0 : index
    %0 = vector.load %arg1[%c0, %c0_0, %c0_1] : memref<1x8x32xf32, #tpu.memory_space<vmem>>, vector<1x8x32xf32>
    %1 = vector.shape_cast %0 : vector<1x8x32xf32> to vector<8x32xf32>
    %c0_2 = arith.constant 0 : index
    %c0_3 = arith.constant 0 : index
    %c0_4 = arith.constant 0 : index
    %2 = vector.load %arg2[%c0_2, %c0_3, %c0_4] : memref<1x8x32xf32, #tpu.memory_space<vmem>>, vector<1x8x32xf32>
    %3 = vector.shape_cast %2 : vector<1x8x32xf32> to vector<8x32xf32>
    %c0_5 = arith.constant 0 : index
    %c0_6 = arith.constant 0 : index
    %c0_7 = arith.constant 0 : index
    %4 = vector.load %arg3[%c0_5, %c0_6, %c0_7] : memref<1x8x32xf32, #tpu.memory_space<vmem>>, vector<1x8x32xf32>
    %5 = vector.shape_cast %4 : vector<1x8x32xf32> to vector<8x32xf32>
    %6 = arith.truncf %1 : vector<8x32xf32> to vector<8x32xbf16>
    %c0_8 = arith.constant 0 : index
    %c0_9 = arith.constant 0 : index
    %7 = vector.load %arg5[%c0_8, %c0_9] : memref<32x32xbf16, #tpu.memory_space<vmem>>, vector<32x32xbf16>
    %cst = arith.constant dense<0.000000e+00> : vector<8x32xf32>
    %8 = tpu.matmul %6, %7, %cst {dimension_numbers = #tpu.dot_dimension_numbers<[1], [0], [0], [1], [0, 0, 1, 1], [], []>} : vector<8x32xbf16>, vector<32x32xbf16>, vector<8x32xf32> -> vector<8x32xf32>
    %c0_10 = arith.constant 0 : index
    %c0_11 = arith.constant 0 : index
    %9 = vector.load %arg6[%c0_10, %c0_11] : memref<1x32xf32, #tpu.memory_space<vmem>>, vector<1x32xf32>
    %10 = vector.broadcast %9 : vector<1x32xf32> to vector<8x32xf32>
    %11 = arith.addf %8, %10 : vector<8x32xf32>
    %cst_12 = arith.constant 0.353553385 : f32
    %12 = vector.broadcast %cst_12 : f32 to vector<8x32xf32>
    %13 = arith.mulf %11, %12 : vector<8x32xf32>
    %14 = vector.shape_cast %13 : vector<8x32xf32> to vector<1x8x32xf32>
    %15 = arith.truncf %3 : vector<8x32xf32> to vector<8x32xbf16>
    %c0_13 = arith.constant 0 : index
    %c0_14 = arith.constant 0 : index
    %16 = vector.load %arg7[%c0_13, %c0_14] : memref<32x32xbf16, #tpu.memory_space<vmem>>, vector<32x32xbf16>
    %cst_15 = arith.constant dense<0.000000e+00> : vector<8x32xf32>
    %17 = tpu.matmul %15, %16, %cst_15 {dimension_numbers = #tpu.dot_dimension_numbers<[1], [0], [0], [1], [0, 0, 1, 1], [], []>} : vector<8x32xbf16>, vector<32x32xbf16>, vector<8x32xf32> -> vector<8x32xf32>
    %c0_16 = arith.constant 0 : index
    %c0_17 = arith.constant 0 : index
    %18 = vector.load %arg8[%c0_16, %c0_17] : memref<1x32xf32, #tpu.memory_space<vmem>>, vector<1x32xf32>
    %19 = vector.broadcast %18 : vector<1x32xf32> to vector<8x32xf32>
    %20 = arith.addf %17, %19 : vector<8x32xf32>
    %21 = vector.shape_cast %20 : vector<8x32xf32> to vector<1x8x32xf32>
    %22 = arith.truncf %5 : vector<8x32xf32> to vector<8x32xbf16>
    %c0_18 = arith.constant 0 : index
    %c0_19 = arith.constant 0 : index
    %23 = vector.load %arg9[%c0_18, %c0_19] : memref<32x32xbf16, #tpu.memory_space<vmem>>, vector<32x32xbf16>
    %cst_20 = arith.constant dense<0.000000e+00> : vector<8x32xf32>
    %24 = tpu.matmul %22, %23, %cst_20 {dimension_numbers = #tpu.dot_dimension_numbers<[1], [0], [0], [1], [0, 0, 1, 1], [], []>} : vector<8x32xbf16>, vector<32x32xbf16>, vector<8x32xf32> -> vector<8x32xf32>
    %c0_21 = arith.constant 0 : index
    %c0_22 = arith.constant 0 : index
    %25 = vector.load %arg10[%c0_21, %c0_22] : memref<1x32xf32, #tpu.memory_space<vmem>>, vector<1x32xf32>
    %26 = vector.broadcast %25 : vector<1x32xf32> to vector<8x32xf32>
    %27 = arith.addf %24, %26 : vector<8x32xf32>
    %28 = vector.shape_cast %27 : vector<8x32xf32> to vector<1x8x32xf32>
    %c0_23 = arith.constant 0 : index
    %c0_24 = arith.constant 0 : index
    %c0_25 = arith.constant 0 : index
    %29 = vector.load %arg4[%c0_23, %c0_24, %c0_25] : memref<1x8x8xi8, #tpu.memory_space<vmem>>, vector<1x8x8xi8>
    %30 = arith.sitofp %29 : vector<1x8x8xi8> to vector<1x8x8xf32>
    %cst_26 = arith.constant -1.000000e+30 : f32
    %31 = vector.broadcast %cst_26 : f32 to vector<1x8x8xf32>
    %32 = arith.mulf %30, %31 : vector<1x8x8xf32>
    %c0_27 = arith.constant 0 : index
    %c0_28 = arith.constant 0 : index
    %33 = vector.load %arg11[%c0_27, %c0_28] : memref<32x32xbf16, #tpu.memory_space<vmem>>, vector<32x32xbf16>
    %cst_29 = arith.constant 0.000000e+00 : f32
    %34 = vector.broadcast %cst_29 : f32 to vector<8x32xf32>
    %35 = vector.extract_strided_slice %14 {offsets = [0, 0, 0], sizes = [1, 8, 8], strides = [1, 1, 1]} : vector<1x8x32xf32> to vector<1x8x8xf32>
    %36 = arith.truncf %35 : vector<1x8x8xf32> to vector<1x8x8xbf16>
    %37 = vector.extract_strided_slice %21 {offsets = [0, 0, 0], sizes = [1, 8, 8], strides = [1, 1, 1]} : vector<1x8x32xf32> to vector<1x8x8xf32>
    %38 = arith.truncf %37 : vector<1x8x8xf32> to vector<1x8x8xbf16>
    %39 = vector.extract_strided_slice %28 {offsets = [0, 0, 0], sizes = [1, 8, 8], strides = [1, 1, 1]} : vector<1x8x32xf32> to vector<1x8x8xf32>
    %40 = arith.truncf %39 : vector<1x8x8xf32> to vector<1x8x8xbf16>
    "tpu.trace_start"() <{level = 10 : i32, message = "bqd,bkd->bqk"}> : () -> ()
    %cst_30 = arith.constant dense<0.000000e+00> : vector<1x8x8xf32>
    %41 = tpu.matmul %36, %38, %cst_30 {dimension_numbers = #tpu.dot_dimension_numbers<[2], [2], [1], [1], [0, 0, 0, 1, 1, 1], [0], [0]>} : vector<1x8x8xbf16>, vector<1x8x8xbf16>, vector<1x8x8xf32> -> vector<1x8x8xf32>
    "tpu.trace_stop"() : () -> ()
    %42 = arith.addf %41, %32 : vector<1x8x8xf32>
    %cst_31 = arith.constant dense<0xFF800000> : vector<1x8xf32>
    %43 = vector.multi_reduction <maximumf>, %42, %cst_31 [2] : vector<1x8x8xf32> to vector<1x8xf32>
    %44 = vector.shape_cast %43 : vector<1x8xf32> to vector<1x8x1xf32>
    %45 = vector.broadcast %44 : vector<1x8x1xf32> to vector<1x8x8xf32>
    %46 = arith.subf %42, %45 : vector<1x8x8xf32>
    %47 = math.exp %46 : vector<1x8x8xf32>
    %cst_32 = arith.constant dense<0.000000e+00> : vector<1x8xf32>
    %48 = vector.multi_reduction <add>, %47, %cst_32 [2] : vector<1x8x8xf32> to vector<1x8xf32>
    %49 = vector.shape_cast %48 : vector<1x8xf32> to vector<1x8x1xf32>
    %50 = tpu.reciprocal %49 {approx = true} : vector<1x8x1xf32> -> vector<1x8x1xf32>
    %51 = vector.broadcast %50 : vector<1x8x1xf32> to vector<1x8x8xf32>
    %52 = arith.mulf %47, %51 : vector<1x8x8xf32>
    %53 = arith.truncf %52 : vector<1x8x8xf32> to vector<1x8x8xbf16>
    "tpu.trace_start"() <{level = 10 : i32, message = "bqk,bkd->bqd"}> : () -> ()
    %cst_33 = arith.constant dense<0.000000e+00> : vector<1x8x8xf32>
    %54 = tpu.matmul %53, %40, %cst_33 {dimension_numbers = #tpu.dot_dimension_numbers<[2], [1], [1], [2], [0, 0, 0, 1, 1, 2], [0], [0]>} : vector<1x8x8xbf16>, vector<1x8x8xbf16>, vector<1x8x8xf32> -> vector<1x8x8xf32>
    "tpu.trace_stop"() : () -> ()
    %55 = vector.shape_cast %54 : vector<1x8x8xf32> to vector<8x8xf32>
    %56 = arith.truncf %55 : vector<8x8xf32> to vector<8x8xbf16>
    %57 = vector.extract_strided_slice %33 {offsets = [0, 0], sizes = [8, 32], strides = [1, 1]} : vector<32x32xbf16> to vector<8x32xbf16>
    %cst_34 = arith.constant dense<0.000000e+00> : vector<8x32xf32>
    %58 = tpu.matmul %56, %57, %cst_34 {dimension_numbers = #tpu.dot_dimension_numbers<[1], [0], [0], [1], [0, 0, 1, 1], [], []>} : vector<8x8xbf16>, vector<8x32xbf16>, vector<8x32xf32> -> vector<8x32xf32>
    %59 = arith.addf %34, %58 : vector<8x32xf32>
    %60 = vector.extract_strided_slice %14 {offsets = [0, 0, 8], sizes = [1, 8, 8], strides = [1, 1, 1]} : vector<1x8x32xf32> to vector<1x8x8xf32>
    %61 = arith.truncf %60 : vector<1x8x8xf32> to vector<1x8x8xbf16>
    %62 = vector.extract_strided_slice %21 {offsets = [0, 0, 8], sizes = [1, 8, 8], strides = [1, 1, 1]} : vector<1x8x32xf32> to vector<1x8x8xf32>
    %63 = arith.truncf %62 : vector<1x8x8xf32> to vector<1x8x8xbf16>
    %64 = vector.extract_strided_slice %28 {offsets = [0, 0, 8], sizes = [1, 8, 8], strides = [1, 1, 1]} : vector<1x8x32xf32> to vector<1x8x8xf32>
    %65 = arith.truncf %64 : vector<1x8x8xf32> to vector<1x8x8xbf16>
    "tpu.trace_start"() <{level = 10 : i32, message = "bqd,bkd->bqk"}> : () -> ()
    %cst_35 = arith.constant dense<0.000000e+00> : vector<1x8x8xf32>
    %66 = tpu.matmul %61, %63, %cst_35 {dimension_numbers = #tpu.dot_dimension_numbers<[2], [2], [1], [1], [0, 0, 0, 1, 1, 1], [0], [0]>} : vector<1x8x8xbf16>, vector<1x8x8xbf16>, vector<1x8x8xf32> -> vector<1x8x8xf32>
    "tpu.trace_stop"() : () -> ()
    %67 = arith.addf %66, %32 : vector<1x8x8xf32>
    %cst_36 = arith.constant dense<0xFF800000> : vector<1x8xf32>
    %68 = vector.multi_reduction <maximumf>, %67, %cst_36 [2] : vector<1x8x8xf32> to vector<1x8xf32>
    %69 = vector.shape_cast %68 : vector<1x8xf32> to vector<1x8x1xf32>
    %70 = vector.broadcast %69 : vector<1x8x1xf32> to vector<1x8x8xf32>
    %71 = arith.subf %67, %70 : vector<1x8x8xf32>
    %72 = math.exp %71 : vector<1x8x8xf32>
    %cst_37 = arith.constant dense<0.000000e+00> : vector<1x8xf32>
    %73 = vector.multi_reduction <add>, %72, %cst_37 [2] : vector<1x8x8xf32> to vector<1x8xf32>
    %74 = vector.shape_cast %73 : vector<1x8xf32> to vector<1x8x1xf32>
    %75 = tpu.reciprocal %74 {approx = true} : vector<1x8x1xf32> -> vector<1x8x1xf32>
    %76 = vector.broadcast %75 : vector<1x8x1xf32> to vector<1x8x8xf32>
    %77 = arith.mulf %72, %76 : vector<1x8x8xf32>
    %78 = arith.truncf %77 : vector<1x8x8xf32> to vector<1x8x8xbf16>
    "tpu.trace_start"() <{level = 10 : i32, message = "bqk,bkd->bqd"}> : () -> ()
    %cst_38 = arith.constant dense<0.000000e+00> : vector<1x8x8xf32>
    %79 = tpu.matmul %78, %65, %cst_38 {dimension_numbers = #tpu.dot_dimension_numbers<[2], [1], [1], [2], [0, 0, 0, 1, 1, 2], [0], [0]>} : vector<1x8x8xbf16>, vector<1x8x8xbf16>, vector<1x8x8xf32> -> vector<1x8x8xf32>
    "tpu.trace_stop"() : () -> ()
    %80 = vector.shape_cast %79 : vector<1x8x8xf32> to vector<8x8xf32>
    %81 = arith.truncf %80 : vector<8x8xf32> to vector<8x8xbf16>
    %82 = vector.extract_strided_slice %33 {offsets = [8, 0], sizes = [8, 32], strides = [1, 1]} : vector<32x32xbf16> to vector<8x32xbf16>
    %cst_39 = arith.constant dense<0.000000e+00> : vector<8x32xf32>
    %83 = tpu.matmul %81, %82, %cst_39 {dimension_numbers = #tpu.dot_dimension_numbers<[1], [0], [0], [1], [0, 0, 1, 1], [], []>} : vector<8x8xbf16>, vector<8x32xbf16>, vector<8x32xf32> -> vector<8x32xf32>
    %84 = arith.addf %59, %83 : vector<8x32xf32>
    %85 = vector.extract_strided_slice %14 {offsets = [0, 0, 16], sizes = [1, 8, 8], strides = [1, 1, 1]} : vector<1x8x32xf32> to vector<1x8x8xf32>
    %86 = arith.truncf %85 : vector<1x8x8xf32> to vector<1x8x8xbf16>
    %87 = vector.extract_strided_slice %21 {offsets = [0, 0, 16], sizes = [1, 8, 8], strides = [1, 1, 1]} : vector<1x8x32xf32> to vector<1x8x8xf32>
    %88 = arith.truncf %87 : vector<1x8x8xf32> to vector<1x8x8xbf16>
    %89 = vector.extract_strided_slice %28 {offsets = [0, 0, 16], sizes = [1, 8, 8], strides = [1, 1, 1]} : vector<1x8x32xf32> to vector<1x8x8xf32>
    %90 = arith.truncf %89 : vector<1x8x8xf32> to vector<1x8x8xbf16>
    "tpu.trace_start"() <{level = 10 : i32, message = "bqd,bkd->bqk"}> : () -> ()
    %cst_40 = arith.constant dense<0.000000e+00> : vector<1x8x8xf32>
    %91 = tpu.matmul %86, %88, %cst_40 {dimension_numbers = #tpu.dot_dimension_numbers<[2], [2], [1], [1], [0, 0, 0, 1, 1, 1], [0], [0]>} : vector<1x8x8xbf16>, vector<1x8x8xbf16>, vector<1x8x8xf32> -> vector<1x8x8xf32>
    "tpu.trace_stop"() : () -> ()
    %92 = arith.addf %91, %32 : vector<1x8x8xf32>
    %cst_41 = arith.constant dense<0xFF800000> : vector<1x8xf32>
    %93 = vector.multi_reduction <maximumf>, %92, %cst_41 [2] : vector<1x8x8xf32> to vector<1x8xf32>
    %94 = vector.shape_cast %93 : vector<1x8xf32> to vector<1x8x1xf32>
    %95 = vector.broadcast %94 : vector<1x8x1xf32> to vector<1x8x8xf32>
    %96 = arith.subf %92, %95 : vector<1x8x8xf32>
    %97 = math.exp %96 : vector<1x8x8xf32>
    %cst_42 = arith.constant dense<0.000000e+00> : vector<1x8xf32>
    %98 = vector.multi_reduction <add>, %97, %cst_42 [2] : vector<1x8x8xf32> to vector<1x8xf32>
    %99 = vector.shape_cast %98 : vector<1x8xf32> to vector<1x8x1xf32>
    %100 = tpu.reciprocal %99 {approx = true} : vector<1x8x1xf32> -> vector<1x8x1xf32>
    %101 = vector.broadcast %100 : vector<1x8x1xf32> to vector<1x8x8xf32>
    %102 = arith.mulf %97, %101 : vector<1x8x8xf32>
    %103 = arith.truncf %102 : vector<1x8x8xf32> to vector<1x8x8xbf16>
    "tpu.trace_start"() <{level = 10 : i32, message = "bqk,bkd->bqd"}> : () -> ()
    %cst_43 = arith.constant dense<0.000000e+00> : vector<1x8x8xf32>
    %104 = tpu.matmul %103, %90, %cst_43 {dimension_numbers = #tpu.dot_dimension_numbers<[2], [1], [1], [2], [0, 0, 0, 1, 1, 2], [0], [0]>} : vector<1x8x8xbf16>, vector<1x8x8xbf16>, vector<1x8x8xf32> -> vector<1x8x8xf32>
    "tpu.trace_stop"() : () -> ()
    %105 = vector.shape_cast %104 : vector<1x8x8xf32> to vector<8x8xf32>
    %106 = arith.truncf %105 : vector<8x8xf32> to vector<8x8xbf16>
    %107 = vector.extract_strided_slice %33 {offsets = [16, 0], sizes = [8, 32], strides = [1, 1]} : vector<32x32xbf16> to vector<8x32xbf16>
    %cst_44 = arith.constant dense<0.000000e+00> : vector<8x32xf32>
    %108 = tpu.matmul %106, %107, %cst_44 {dimension_numbers = #tpu.dot_dimension_numbers<[1], [0], [0], [1], [0, 0, 1, 1], [], []>} : vector<8x8xbf16>, vector<8x32xbf16>, vector<8x32xf32> -> vector<8x32xf32>
    %109 = arith.addf %84, %108 : vector<8x32xf32>
    %110 = vector.extract_strided_slice %14 {offsets = [0, 0, 24], sizes = [1, 8, 8], strides = [1, 1, 1]} : vector<1x8x32xf32> to vector<1x8x8xf32>
    %111 = arith.truncf %110 : vector<1x8x8xf32> to vector<1x8x8xbf16>
    %112 = vector.extract_strided_slice %21 {offsets = [0, 0, 24], sizes = [1, 8, 8], strides = [1, 1, 1]} : vector<1x8x32xf32> to vector<1x8x8xf32>
    %113 = arith.truncf %112 : vector<1x8x8xf32> to vector<1x8x8xbf16>
    %114 = vector.extract_strided_slice %28 {offsets = [0, 0, 24], sizes = [1, 8, 8], strides = [1, 1, 1]} : vector<1x8x32xf32> to vector<1x8x8xf32>
    %115 = arith.truncf %114 : vector<1x8x8xf32> to vector<1x8x8xbf16>
    "tpu.trace_start"() <{level = 10 : i32, message = "bqd,bkd->bqk"}> : () -> ()
    %cst_45 = arith.constant dense<0.000000e+00> : vector<1x8x8xf32>
    %116 = tpu.matmul %111, %113, %cst_45 {dimension_numbers = #tpu.dot_dimension_numbers<[2], [2], [1], [1], [0, 0, 0, 1, 1, 1], [0], [0]>} : vector<1x8x8xbf16>, vector<1x8x8xbf16>, vector<1x8x8xf32> -> vector<1x8x8xf32>
    "tpu.trace_stop"() : () -> ()
    %117 = arith.addf %116, %32 : vector<1x8x8xf32>
    %cst_46 = arith.constant dense<0xFF800000> : vector<1x8xf32>
    %118 = vector.multi_reduction <maximumf>, %117, %cst_46 [2] : vector<1x8x8xf32> to vector<1x8xf32>
    %119 = vector.shape_cast %118 : vector<1x8xf32> to vector<1x8x1xf32>
    %120 = vector.broadcast %119 : vector<1x8x1xf32> to vector<1x8x8xf32>
    %121 = arith.subf %117, %120 : vector<1x8x8xf32>
    %122 = math.exp %121 : vector<1x8x8xf32>
    %cst_47 = arith.constant dense<0.000000e+00> : vector<1x8xf32>
    %123 = vector.multi_reduction <add>, %122, %cst_47 [2] : vector<1x8x8xf32> to vector<1x8xf32>
    %124 = vector.shape_cast %123 : vector<1x8xf32> to vector<1x8x1xf32>
    %125 = tpu.reciprocal %124 {approx = true} : vector<1x8x1xf32> -> vector<1x8x1xf32>
    %126 = vector.broadcast %125 : vector<1x8x1xf32> to vector<1x8x8xf32>
    %127 = arith.mulf %122, %126 : vector<1x8x8xf32>
    %128 = arith.truncf %127 : vector<1x8x8xf32> to vector<1x8x8xbf16>
    "tpu.trace_start"() <{level = 10 : i32, message = "bqk,bkd->bqd"}> : () -> ()
    %cst_48 = arith.constant dense<0.000000e+00> : vector<1x8x8xf32>
    %129 = tpu.matmul %128, %115, %cst_48 {dimension_numbers = #tpu.dot_dimension_numbers<[2], [1], [1], [2], [0, 0, 0, 1, 1, 2], [0], [0]>} : vector<1x8x8xbf16>, vector<1x8x8xbf16>, vector<1x8x8xf32> -> vector<1x8x8xf32>
    "tpu.trace_stop"() : () -> ()
    %130 = vector.shape_cast %129 : vector<1x8x8xf32> to vector<8x8xf32>
    %131 = arith.truncf %130 : vector<8x8xf32> to vector<8x8xbf16>
    %132 = vector.extract_strided_slice %33 {offsets = [24, 0], sizes = [8, 32], strides = [1, 1]} : vector<32x32xbf16> to vector<8x32xbf16>
    %cst_49 = arith.constant dense<0.000000e+00> : vector<8x32xf32>
    %133 = tpu.matmul %131, %132, %cst_49 {dimension_numbers = #tpu.dot_dimension_numbers<[1], [0], [0], [1], [0, 0, 1, 1], [], []>} : vector<8x8xbf16>, vector<8x32xbf16>, vector<8x32xf32> -> vector<8x32xf32>
    %134 = arith.addf %109, %133 : vector<8x32xf32>
    %c0_50 = arith.constant 0 : index
    %c0_51 = arith.constant 0 : index
    %135 = vector.load %arg12[%c0_50, %c0_51] : memref<1x32xf32, #tpu.memory_space<vmem>>, vector<1x32xf32>
    %136 = vector.broadcast %135 : vector<1x32xf32> to vector<8x32xf32>
    %137 = arith.addf %134, %136 : vector<8x32xf32>
    %138 = arith.addf %137, %1 : vector<8x32xf32>
    %cst_52 = arith.constant dense<0.000000e+00> : vector<8xf32>
    %139 = vector.multi_reduction <add>, %138, %cst_52 [1] : vector<8x32xf32> to vector<8xf32>
    %140 = vector.shape_cast %139 : vector<8xf32> to vector<8x1xf32>
    %cst_53 = arith.constant 3.200000e+01 : f32
    %141 = vector.broadcast %cst_53 : f32 to vector<8x1xf32>
    %142 = arith.divf %140, %141 : vector<8x1xf32>
    %143 = vector.broadcast %142 : vector<8x1xf32> to vector<8x32xf32>
    %144 = arith.subf %138, %143 : vector<8x32xf32>
    %145 = arith.mulf %144, %144 : vector<8x32xf32>
    %cst_54 = arith.constant dense<0.000000e+00> : vector<8xf32>
    %146 = vector.multi_reduction <add>, %145, %cst_54 [1] : vector<8x32xf32> to vector<8xf32>
    %147 = vector.shape_cast %146 : vector<8xf32> to vector<8x1xf32>
    %cst_55 = arith.constant 3.200000e+01 : f32
    %148 = vector.broadcast %cst_55 : f32 to vector<8x1xf32>
    %149 = arith.divf %147, %148 : vector<8x1xf32>
    %cst_56 = arith.constant 9.99999974E-6 : f32
    %150 = vector.broadcast %cst_56 : f32 to vector<8x1xf32>
    %151 = arith.addf %149, %150 : vector<8x1xf32>
    %152 = math.rsqrt %151 : vector<8x1xf32>
    %153 = vector.broadcast %152 : vector<8x1xf32> to vector<8x32xf32>
    %154 = arith.mulf %144, %153 : vector<8x32xf32>
    %c0_57 = arith.constant 0 : index
    %c0_58 = arith.constant 0 : index
    %155 = vector.load %arg13[%c0_57, %c0_58] : memref<1x32xf32, #tpu.memory_space<vmem>>, vector<1x32xf32>
    %156 = vector.broadcast %155 : vector<1x32xf32> to vector<8x32xf32>
    %157 = arith.mulf %154, %156 : vector<8x32xf32>
    %c0_59 = arith.constant 0 : index
    %c0_60 = arith.constant 0 : index
    %158 = vector.load %arg14[%c0_59, %c0_60] : memref<1x32xf32, #tpu.memory_space<vmem>>, vector<1x32xf32>
    %159 = vector.broadcast %158 : vector<1x32xf32> to vector<8x32xf32>
    %160 = arith.addf %157, %159 : vector<8x32xf32>
    %161 = vector.shape_cast %160 : vector<8x32xf32> to vector<1x2x128xf32>
    %c0_61 = arith.constant 0 : index
    %c0_62 = arith.constant 0 : index
    %c0_63 = arith.constant 0 : index
    %162 = vector.load %arg15[%c0_61, %c0_62, %c0_63] : memref<1x2x128xf32, #tpu.memory_space<vmem>>, vector<1x2x128xf32>
    tpu.vector_store %arg15[%c0_61, %c0_62, %c0_63], %161 {strides = array<i32>} : memref<1x2x128xf32, #tpu.memory_space<vmem>>, vector<1x2x128xf32>,
    return
  }
  func.func @transform_0(%arg0: i32) -> (i32, i32, i32) {
    %c0_i32 = arith.constant 0 : i32
    %c0_i32_0 = arith.constant 0 : i32
    %c0_i32_1 = arith.constant 0 : i32
    return %arg0, %c0_i32, %c0_i32_0 : i32, i32, i32
  }
  func.func @transform_1(%arg0: i32) -> (i32, i32, i32) {
    %c0_i32 = arith.constant 0 : i32
    %c0_i32_0 = arith.constant 0 : i32
    %c0_i32_1 = arith.constant 0 : i32
    return %arg0, %c0_i32, %c0_i32_0 : i32, i32, i32
  }
  func.func @transform_2(%arg0: i32) -> (i32, i32, i32) {
    %c0_i32 = arith.constant 0 : i32
    %c0_i32_0 = arith.constant 0 : i32
    %c0_i32_1 = arith.constant 0 : i32
    return %arg0, %c0_i32, %c0_i32_0 : i32, i32, i32
  }
  func.func @transform_3(%arg0: i32) -> (i32, i32, i32) {
    %c0_i32 = arith.constant 0 : i32
    %c0_i32_0 = arith.constant 0 : i32
    %c0_i32_1 = arith.constant 0 : i32
    return %arg0, %c0_i32, %c0_i32_0 : i32, i32, i32
  }
  func.func @transform_4(%arg0: i32) -> (i32, i32) {
    %c0_i32 = arith.constant 0 : i32
    %c0_i32_0 = arith.constant 0 : i32
    %c0_i32_1 = arith.constant 0 : i32
    return %c0_i32, %c0_i32_0 : i32, i32
  }
  func.func @transform_5(%arg0: i32) -> (i32, i32) {
    %c0_i32 = arith.constant 0 : i32
    %c0_i32_0 = arith.constant 0 : i32
    %c0_i32_1 = arith.constant 0 : i32
    return %c0_i32, %c0_i32_0 : i32, i32
  }
  func.func @transform_6(%arg0: i32) -> (i32, i32) {
    %c0_i32 = arith.constant 0 : i32
    %c0_i32_0 = arith.constant 0 : i32
    %c0_i32_1 = arith.constant 0 : i32
    return %c0_i32, %c0_i32_0 : i32, i32
  }
  func.func @transform_7(%arg0: i32) -> (i32, i32) {
    %c0_i32 = arith.constant 0 : i32
    %c0_i32_0 = arith.constant 0 : i32
    %c0_i32_1 = arith.constant 0 : i32
    return %c0_i32, %c0_i32_0 : i32, i32
  }
  func.func @transform_8(%arg0: i32) -> (i32, i32) {
    %c0_i32 = arith.constant 0 : i32
    %c0_i32_0 = arith.constant 0 : i32
    %c0_i32_1 = arith.constant 0 : i32
    return %c0_i32, %c0_i32_0 : i32, i32
  }
  func.func @transform_9(%arg0: i32) -> (i32, i32) {
    %c0_i32 = arith.constant 0 : i32
    %c0_i32_0 = arith.constant 0 : i32
    %c0_i32_1 = arith.constant 0 : i32
    return %c0_i32, %c0_i32_0 : i32, i32
  }
  func.func @transform_10(%arg0: i32) -> (i32, i32) {
    %c0_i32 = arith.constant 0 : i32
    %c0_i32_0 = arith.constant 0 : i32
    %c0_i32_1 = arith.constant 0 : i32
    return %c0_i32, %c0_i32_0 : i32, i32
  }
  func.func @transform_11(%arg0: i32) -> (i32, i32) {
    %c0_i32 = arith.constant 0 : i32
    %c0_i32_0 = arith.constant 0 : i32
    %c0_i32_1 = arith.constant 0 : i32
    return %c0_i32, %c0_i32_0 : i32, i32
  }
  func.func @transform_12(%arg0: i32) -> (i32, i32) {
    %c0_i32 = arith.constant 0 : i32
    %c0_i32_0 = arith.constant 0 : i32
    %c0_i32_1 = arith.constant 0 : i32
    return %c0_i32, %c0_i32_0 : i32, i32
  }
  func.func @transform_13(%arg0: i32) -> (i32, i32) {
    %c0_i32 = arith.constant 0 : i32
    %c0_i32_0 = arith.constant 0 : i32
    %c0_i32_1 = arith.constant 0 : i32
    return %c0_i32, %c0_i32_0 : i32, i32
  }
  func.func @transform_14(%arg0: i32) -> (i32, i32, i32) {
    %c0_i32 = arith.constant 0 : i32
    %c0_i32_0 = arith.constant 0 : i32
    %c0_i32_1 = arith.constant 0 : i32
    return %arg0, %c0_i32, %c0_i32_0 : i32, i32, i32
  }
}

module attributes {stable_mosaic.version = 11 : i64} {
  func.func @_mha_kernel(%arg0: i32, %arg1: memref<1x8x32xf32, #tpu.memory_space<vmem>>, %arg2: memref<1x8x32xf32, #tpu.memory_space<vmem>>, %arg3: memref<1x8x32xf32, #tpu.memory_space<vmem>>, %arg4: memref<1x8x8xi8, #tpu.memory_space<vmem>>, %arg5: memref<32x32xbf16, #tpu.memory_space<vmem>>, %arg6: memref<1x32xf32, #tpu.memory_space<vmem>>, %arg7: memref<32x32xbf16, #tpu.memory_space<vmem>>, %arg8: memref<1x32xf32, #tpu.memory_space<vmem>>, %arg9: memref<32x32xbf16, #tpu.memory_space<vmem>>, %arg10: memref<1x32xf32, #tpu.memory_space<vmem>>, %arg11: memref<32x32xbf16, #tpu.memory_space<vmem>>, %arg12: memref<1x32xf32, #tpu.memory_space<vmem>>, %arg13: memref<1x32xf32, #tpu.memory_space<vmem>>, %arg14: memref<1x32xf32, #tpu.memory_space<vmem>>, %arg15: memref<1x8x32xf32, #tpu.memory_space<vmem>>) attributes {dimension_semantics = [#tpu.dimension_semantics<parallel>], iteration_bounds = array<i64: 4>, scalar_prefetch = 0 : i64, scratch_operands = 0 : i64, tpu.core_type = #tpu.core_type<tc>, window_params = [{transform_indices = @transform_0, window_bounds = array<i64: 1, 8, 32>}, {transform_indices = @transform_1, window_bounds = array<i64: 1, 8, 32>}, {transform_indices = @transform_2, window_bounds = array<i64: 1, 8, 32>}, {transform_indices = @transform_3, window_bounds = array<i64: 1, 8, 8>}, {pipeline_mode = #tpu.pipeline_mode<synchronous>, transform_indices = @transform_4, window_bounds = array<i64: 32, 32>}, {pipeline_mode = #tpu.pipeline_mode<synchronous>, transform_indices = @transform_5, window_bounds = array<i64: 1, 32>}, {pipeline_mode = #tpu.pipeline_mode<synchronous>, transform_indices = @transform_6, window_bounds = array<i64: 32, 32>}, {pipeline_mode = #tpu.pipeline_mode<synchronous>, transform_indices = @transform_7, window_bounds = array<i64: 1, 32>}, {pipeline_mode = #tpu.pipeline_mode<synchronous>, transform_indices = @transform_8, window_bounds = array<i64: 32, 32>}, {pipeline_mode = #tpu.pipeline_mode<synchronous>, transform_indices = @transform_9, window_bounds = array<i64: 1, 32>}, {pipeline_mode = #tpu.pipeline_mode<synchronous>, transform_indices = @transform_10, window_bounds = array<i64: 32, 32>}, {pipeline_mode = #tpu.pipeline_mode<synchronous>, transform_indices = @transform_11, window_bounds = array<i64: 1, 32>}, {pipeline_mode = #tpu.pipeline_mode<synchronous>, transform_indices = @transform_12, window_bounds = array<i64: 1, 32>}, {pipeline_mode = #tpu.pipeline_mode<synchronous>, transform_indices = @transform_13, window_bounds = array<i64: 1, 32>}, {transform_indices = @transform_14, window_bounds = array<i64: 1, 8, 32>}]} {
    %c0 = arith.constant 0 : index
    %c0_0 = arith.constant 0 : index
    %c0_1 = arith.constant 0 : index
    %0 = vector.load %arg1[%c0, %c0_0, %c0_1] : memref<1x8x32xf32, #tpu.memory_space<vmem>>, vector<1x8x32xf32>
    %1 = vector.shape_cast %0 : vector<1x8x32xf32> to vector<8x32xf32>
    %c0_2 = arith.constant 0 : index
    %c0_3 = arith.constant 0 : index
    %c0_4 = arith.constant 0 : index
    %2 = vector.load %arg2[%c0_2, %c0_3, %c0_4] : memref<1x8x32xf32, #tpu.memory_space<vmem>>, vector<1x8x32xf32>
    %3 = vector.shape_cast %2 : vector<1x8x32xf32> to vector<8x32xf32>
    %c0_5 = arith.constant 0 : index
    %c0_6 = arith.constant 0 : index
    %c0_7 = arith.constant 0 : index
    %4 = vector.load %arg3[%c0_5, %c0_6, %c0_7] : memref<1x8x32xf32, #tpu.memory_space<vmem>>, vector<1x8x32xf32>
    %5 = vector.shape_cast %4 : vector<1x8x32xf32> to vector<8x32xf32>
    %6 = arith.truncf %1 : vector<8x32xf32> to vector<8x32xbf16>
    %c0_8 = arith.constant 0 : index
    %c0_9 = arith.constant 0 : index
    %7 = vector.load %arg5[%c0_8, %c0_9] : memref<32x32xbf16, #tpu.memory_space<vmem>>, vector<32x32xbf16>
    %cst = arith.constant dense<0.000000e+00> : vector<8x32xf32>
    %8 = tpu.matmul %6, %7, %cst {dimension_numbers = #tpu.dot_dimension_numbers<[1], [0], [0], [1], [0, 0, 1, 1], [], []>} : vector<8x32xbf16>, vector<32x32xbf16>, vector<8x32xf32> -> vector<8x32xf32>
    %c0_10 = arith.constant 0 : index
    %c0_11 = arith.constant 0 : index
    %9 = vector.load %arg6[%c0_10, %c0_11] : memref<1x32xf32, #tpu.memory_space<vmem>>, vector<1x32xf32>
    %10 = vector.broadcast %9 : vector<1x32xf32> to vector<8x32xf32>
    %11 = arith.addf %8, %10 : vector<8x32xf32>
    %cst_12 = arith.constant 0.353553385 : f32
    %12 = vector.broadcast %cst_12 : f32 to vector<8x32xf32>
    %13 = arith.mulf %11, %12 : vector<8x32xf32>
    %14 = vector.shape_cast %13 : vector<8x32xf32> to vector<1x8x32xf32>
    %15 = arith.truncf %3 : vector<8x32xf32> to vector<8x32xbf16>
    %c0_13 = arith.constant 0 : index
    %c0_14 = arith.constant 0 : index
    %16 = vector.load %arg7[%c0_13, %c0_14] : memref<32x32xbf16, #tpu.memory_space<vmem>>, vector<32x32xbf16>
    %cst_15 = arith.constant dense<0.000000e+00> : vector<8x32xf32>
    %17 = tpu.matmul %15, %16, %cst_15 {dimension_numbers = #tpu.dot_dimension_numbers<[1], [0], [0], [1], [0, 0, 1, 1], [], []>} : vector<8x32xbf16>, vector<32x32xbf16>, vector<8x32xf32> -> vector<8x32xf32>
    %c0_16 = arith.constant 0 : index
    %c0_17 = arith.constant 0 : index
    %18 = vector.load %arg8[%c0_16, %c0_17] : memref<1x32xf32, #tpu.memory_space<vmem>>, vector<1x32xf32>
    %19 = vector.broadcast %18 : vector<1x32xf32> to vector<8x32xf32>
    %20 = arith.addf %17, %19 : vector<8x32xf32>
    %21 = vector.shape_cast %20 : vector<8x32xf32> to vector<1x8x32xf32>
    %22 = arith.truncf %5 : vector<8x32xf32> to vector<8x32xbf16>
    %c0_18 = arith.constant 0 : index
    %c0_19 = arith.constant 0 : index
    %23 = vector.load %arg9[%c0_18, %c0_19] : memref<32x32xbf16, #tpu.memory_space<vmem>>, vector<32x32xbf16>
    %cst_20 = arith.constant dense<0.000000e+00> : vector<8x32xf32>
    %24 = tpu.matmul %22, %23, %cst_20 {dimension_numbers = #tpu.dot_dimension_numbers<[1], [0], [0], [1], [0, 0, 1, 1], [], []>} : vector<8x32xbf16>, vector<32x32xbf16>, vector<8x32xf32> -> vector<8x32xf32>
    %c0_21 = arith.constant 0 : index
    %c0_22 = arith.constant 0 : index
    %25 = vector.load %arg10[%c0_21, %c0_22] : memref<1x32xf32, #tpu.memory_space<vmem>>, vector<1x32xf32>
    %26 = vector.broadcast %25 : vector<1x32xf32> to vector<8x32xf32>
    %27 = arith.addf %24, %26 : vector<8x32xf32>
    %28 = vector.shape_cast %27 : vector<8x32xf32> to vector<1x8x32xf32>
    %c0_23 = arith.constant 0 : index
    %c0_24 = arith.constant 0 : index
    %c0_25 = arith.constant 0 : index
    %29 = vector.load %arg4[%c0_23, %c0_24, %c0_25] : memref<1x8x8xi8, #tpu.memory_space<vmem>>, vector<1x8x8xi8>
    %30 = arith.sitofp %29 : vector<1x8x8xi8> to vector<1x8x8xf32>
    %cst_26 = arith.constant -1.000000e+30 : f32
    %31 = vector.broadcast %cst_26 : f32 to vector<1x8x8xf32>
    %32 = arith.mulf %30, %31 : vector<1x8x8xf32>
    %c0_27 = arith.constant 0 : index
    %c0_28 = arith.constant 0 : index
    %33 = vector.load %arg11[%c0_27, %c0_28] : memref<32x32xbf16, #tpu.memory_space<vmem>>, vector<32x32xbf16>
    %cst_29 = arith.constant 0.000000e+00 : f32
    %34 = vector.broadcast %cst_29 : f32 to vector<8x32xf32>
    %35 = vector.extract_strided_slice %14 {offsets = [0, 0, 0], sizes = [1, 8, 8], strides = [1, 1, 1]} : vector<1x8x32xf32> to vector<1x8x8xf32>
    %36 = arith.truncf %35 : vector<1x8x8xf32> to vector<1x8x8xbf16>
    %37 = vector.extract_strided_slice %21 {offsets = [0, 0, 0], sizes = [1, 8, 8], strides = [1, 1, 1]} : vector<1x8x32xf32> to vector<1x8x8xf32>
    %38 = arith.truncf %37 : vector<1x8x8xf32> to vector<1x8x8xbf16>
    %39 = vector.extract_strided_slice %28 {offsets = [0, 0, 0], sizes = [1, 8, 8], strides = [1, 1, 1]} : vector<1x8x32xf32> to vector<1x8x8xf32>
    %40 = arith.truncf %39 : vector<1x8x8xf32> to vector<1x8x8xbf16>
    "tpu.trace_start"() <{level = 10 : i32, message = "bqd,bkd->bqk"}> : () -> ()
    %cst_30 = arith.constant dense<0.000000e+00> : vector<1x8x8xf32>
    %41 = tpu.matmul %36, %38, %cst_30 {dimension_numbers = #tpu.dot_dimension_numbers<[2], [2], [1], [1], [0, 0, 0, 1, 1, 1], [0], [0]>} : vector<1x8x8xbf16>, vector<1x8x8xbf16>, vector<1x8x8xf32> -> vector<1x8x8xf32>
    "tpu.trace_stop"() : () -> ()
    %42 = arith.addf %41, %32 : vector<1x8x8xf32>
    %cst_31 = arith.constant dense<0xFF800000> : vector<1x8xf32>
    %43 = vector.multi_reduction <maximumf>, %42, %cst_31 [2] : vector<1x8x8xf32> to vector<1x8xf32>
    %44 = vector.shape_cast %43 : vector<1x8xf32> to vector<1x8x1xf32>
    %45 = vector.broadcast %44 : vector<1x8x1xf32> to vector<1x8x8xf32>
    %46 = arith.subf %42, %45 : vector<1x8x8xf32>
    %47 = math.exp %46 : vector<1x8x8xf32>
    %cst_32 = arith.constant dense<0.000000e+00> : vector<1x8xf32>
    %48 = vector.multi_reduction <add>, %47, %cst_32 [2] : vector<1x8x8xf32> to vector<1x8xf32>
    %49 = vector.shape_cast %48 : vector<1x8xf32> to vector<1x8x1xf32>
    %50 = tpu.reciprocal %49 {approx = true} : vector<1x8x1xf32> -> vector<1x8x1xf32>
    %51 = vector.broadcast %50 : vector<1x8x1xf32> to vector<1x8x8xf32>
    %52 = arith.mulf %47, %51 : vector<1x8x8xf32>
    %53 = arith.truncf %52 : vector<1x8x8xf32> to vector<1x8x8xbf16>
    "tpu.trace_start"() <{level = 10 : i32, message = "bqk,bkd->bqd"}> : () -> ()
    %cst_33 = arith.constant dense<0.000000e+00> : vector<1x8x8xf32>
    %54 = tpu.matmul %53, %40, %cst_33 {dimension_numbers = #tpu.dot_dimension_numbers<[2], [1], [1], [2], [0, 0, 0, 1, 1, 2], [0], [0]>} : vector<1x8x8xbf16>, vector<1x8x8xbf16>, vector<1x8x8xf32> -> vector<1x8x8xf32>
    "tpu.trace_stop"() : () -> ()
    %55 = vector.shape_cast %54 : vector<1x8x8xf32> to vector<8x8xf32>
    %56 = arith.truncf %55 : vector<8x8xf32> to vector<8x8xbf16>
    %57 = vector.extract_strided_slice %33 {offsets = [0, 0], sizes = [8, 32], strides = [1, 1]} : vector<32x32xbf16> to vector<8x32xbf16>
    %cst_34 = arith.constant dense<0.000000e+00> : vector<8x32xf32>
    %58 = tpu.matmul %56, %57, %cst_34 {dimension_numbers = #tpu.dot_dimension_numbers<[1], [0], [0], [1], [0, 0, 1, 1], [], []>} : vector<8x8xbf16>, vector<8x32xbf16>, vector<8x32xf32> -> vector<8x32xf32>
    %59 = arith.addf %34, %58 : vector<8x32xf32>
    %60 = vector.extract_strided_slice %14 {offsets = [0, 0, 8], sizes = [1, 8, 8], strides = [1, 1, 1]} : vector<1x8x32xf32> to vector<1x8x8xf32>
    %61 = arith.truncf %60 : vector<1x8x8xf32> to vector<1x8x8xbf16>
    %62 = vector.extract_strided_slice %21 {offsets = [0, 0, 8], sizes = [1, 8, 8], strides = [1, 1, 1]} : vector<1x8x32xf32> to vector<1x8x8xf32>
    %63 = arith.truncf %62 : vector<1x8x8xf32> to vector<1x8x8xbf16>
    %64 = vector.extract_strided_slice %28 {offsets = [0, 0, 8], sizes = [1, 8, 8], strides = [1, 1, 1]} : vector<1x8x32xf32> to vector<1x8x8xf32>
    %65 = arith.truncf %64 : vector<1x8x8xf32> to vector<1x8x8xbf16>
    "tpu.trace_start"() <{level = 10 : i32, message = "bqd,bkd->bqk"}> : () -> ()
    %cst_35 = arith.constant dense<0.000000e+00> : vector<1x8x8xf32>
    %66 = tpu.matmul %61, %63, %cst_35 {dimension_numbers = #tpu.dot_dimension_numbers<[2], [2], [1], [1], [0, 0, 0, 1, 1, 1], [0], [0]>} : vector<1x8x8xbf16>, vector<1x8x8xbf16>, vector<1x8x8xf32> -> vector<1x8x8xf32>
    "tpu.trace_stop"() : () -> ()
    %67 = arith.addf %66, %32 : vector<1x8x8xf32>
    %cst_36 = arith.constant dense<0xFF800000> : vector<1x8xf32>
    %68 = vector.multi_reduction <maximumf>, %67, %cst_36 [2] : vector<1x8x8xf32> to vector<1x8xf32>
    %69 = vector.shape_cast %68 : vector<1x8xf32> to vector<1x8x1xf32>
    %70 = vector.broadcast %69 : vector<1x8x1xf32> to vector<1x8x8xf32>
    %71 = arith.subf %67, %70 : vector<1x8x8xf32>
    %72 = math.exp %71 : vector<1x8x8xf32>
    %cst_37 = arith.constant dense<0.000000e+00> : vector<1x8xf32>
    %73 = vector.multi_reduction <add>, %72, %cst_37 [2] : vector<1x8x8xf32> to vector<1x8xf32>
    %74 = vector.shape_cast %73 : vector<1x8xf32> to vector<1x8x1xf32>
    %75 = tpu.reciprocal %74 {approx = true} : vector<1x8x1xf32> -> vector<1x8x1xf32>
    %76 = vector.broadcast %75 : vector<1x8x1xf32> to vector<1x8x8xf32>
    %77 = arith.mulf %72, %76 : vector<1x8x8xf32>
    %78 = arith.truncf %77 : vector<1x8x8xf32> to vector<1x8x8xbf16>
    "tpu.trace_start"() <{level = 10 : i32, message = "bqk,bkd->bqd"}> : () -> ()
    %cst_38 = arith.constant dense<0.000000e+00> : vector<1x8x8xf32>
    %79 = tpu.matmul %78, %65, %cst_38 {dimension_numbers = #tpu.dot_dimension_numbers<[2], [1], [1], [2], [0, 0, 0, 1, 1, 2], [0], [0]>} : vector<1x8x8xbf16>, vector<1x8x8xbf16>, vector<1x8x8xf32> -> vector<1x8x8xf32>
    "tpu.trace_stop"() : () -> ()
    %80 = vector.shape_cast %79 : vector<1x8x8xf32> to vector<8x8xf32>
    %81 = arith.truncf %80 : vector<8x8xf32> to vector<8x8xbf16>
    %82 = vector.extract_strided_slice %33 {offsets = [8, 0], sizes = [8, 32], strides = [1, 1]} : vector<32x32xbf16> to vector<8x32xbf16>
    %cst_39 = arith.constant dense<0.000000e+00> : vector<8x32xf32>
    %83 = tpu.matmul %81, %82, %cst_39 {dimension_numbers = #tpu.dot_dimension_numbers<[1], [0], [0], [1], [0, 0, 1, 1], [], []>} : vector<8x8xbf16>, vector<8x32xbf16>, vector<8x32xf32> -> vector<8x32xf32>
    %84 = arith.addf %59, %83 : vector<8x32xf32>
    %85 = vector.extract_strided_slice %14 {offsets = [0, 0, 16], sizes = [1, 8, 8], strides = [1, 1, 1]} : vector<1x8x32xf32> to vector<1x8x8xf32>
    %86 = arith.truncf %85 : vector<1x8x8xf32> to vector<1x8x8xbf16>
    %87 = vector.extract_strided_slice %21 {offsets = [0, 0, 16], sizes = [1, 8, 8], strides = [1, 1, 1]} : vector<1x8x32xf32> to vector<1x8x8xf32>
    %88 = arith.truncf %87 : vector<1x8x8xf32> to vector<1x8x8xbf16>
    %89 = vector.extract_strided_slice %28 {offsets = [0, 0, 16], sizes = [1, 8, 8], strides = [1, 1, 1]} : vector<1x8x32xf32> to vector<1x8x8xf32>
    %90 = arith.truncf %89 : vector<1x8x8xf32> to vector<1x8x8xbf16>
    "tpu.trace_start"() <{level = 10 : i32, message = "bqd,bkd->bqk"}> : () -> ()
    %cst_40 = arith.constant dense<0.000000e+00> : vector<1x8x8xf32>
    %91 = tpu.matmul %86, %88, %cst_40 {dimension_numbers = #tpu.dot_dimension_numbers<[2], [2], [1], [1], [0, 0, 0, 1, 1, 1], [0], [0]>} : vector<1x8x8xbf16>, vector<1x8x8xbf16>, vector<1x8x8xf32> -> vector<1x8x8xf32>
    "tpu.trace_stop"() : () -> ()
    %92 = arith.addf %91, %32 : vector<1x8x8xf32>
    %cst_41 = arith.constant dense<0xFF800000> : vector<1x8xf32>
    %93 = vector.multi_reduction <maximumf>, %92, %cst_41 [2] : vector<1x8x8xf32> to vector<1x8xf32>
    %94 = vector.shape_cast %93 : vector<1x8xf32> to vector<1x8x1xf32>
    %95 = vector.broadcast %94 : vector<1x8x1xf32> to vector<1x8x8xf32>
    %96 = arith.subf %92, %95 : vector<1x8x8xf32>
    %97 = math.exp %96 : vector<1x8x8xf32>
    %cst_42 = arith.constant dense<0.000000e+00> : vector<1x8xf32>
    %98 = vector.multi_reduction <add>, %97, %cst_42 [2] : vector<1x8x8xf32> to vector<1x8xf32>
    %99 = vector.shape_cast %98 : vector<1x8xf32> to vector<1x8x1xf32>
    %100 = tpu.reciprocal %99 {approx = true} : vector<1x8x1xf32> -> vector<1x8x1xf32>
    %101 = vector.broadcast %100 : vector<1x8x1xf32> to vector<1x8x8xf32>
    %102 = arith.mulf %97, %101 : vector<1x8x8xf32>
    %103 = arith.truncf %102 : vector<1x8x8xf32> to vector<1x8x8xbf16>
    "tpu.trace_start"() <{level = 10 : i32, message = "bqk,bkd->bqd"}> : () -> ()
    %cst_43 = arith.constant dense<0.000000e+00> : vector<1x8x8xf32>
    %104 = tpu.matmul %103, %90, %cst_43 {dimension_numbers = #tpu.dot_dimension_numbers<[2], [1], [1], [2], [0, 0, 0, 1, 1, 2], [0], [0]>} : vector<1x8x8xbf16>, vector<1x8x8xbf16>, vector<1x8x8xf32> -> vector<1x8x8xf32>
    "tpu.trace_stop"() : () -> ()
    %105 = vector.shape_cast %104 : vector<1x8x8xf32> to vector<8x8xf32>
    %106 = arith.truncf %105 : vector<8x8xf32> to vector<8x8xbf16>
    %107 = vector.extract_strided_slice %33 {offsets = [16, 0], sizes = [8, 32], strides = [1, 1]} : vector<32x32xbf16> to vector<8x32xbf16>
    %cst_44 = arith.constant dense<0.000000e+00> : vector<8x32xf32>
    %108 = tpu.matmul %106, %107, %cst_44 {dimension_numbers = #tpu.dot_dimension_numbers<[1], [0], [0], [1], [0, 0, 1, 1], [], []>} : vector<8x8xbf16>, vector<8x32xbf16>, vector<8x32xf32> -> vector<8x32xf32>
    %109 = arith.addf %84, %108 : vector<8x32xf32>
    %110 = vector.extract_strided_slice %14 {offsets = [0, 0, 24], sizes = [1, 8, 8], strides = [1, 1, 1]} : vector<1x8x32xf32> to vector<1x8x8xf32>
    %111 = arith.truncf %110 : vector<1x8x8xf32> to vector<1x8x8xbf16>
    %112 = vector.extract_strided_slice %21 {offsets = [0, 0, 24], sizes = [1, 8, 8], strides = [1, 1, 1]} : vector<1x8x32xf32> to vector<1x8x8xf32>
    %113 = arith.truncf %112 : vector<1x8x8xf32> to vector<1x8x8xbf16>
    %114 = vector.extract_strided_slice %28 {offsets = [0, 0, 24], sizes = [1, 8, 8], strides = [1, 1, 1]} : vector<1x8x32xf32> to vector<1x8x8xf32>
    %115 = arith.truncf %114 : vector<1x8x8xf32> to vector<1x8x8xbf16>
    "tpu.trace_start"() <{level = 10 : i32, message = "bqd,bkd->bqk"}> : () -> ()
    %cst_45 = arith.constant dense<0.000000e+00> : vector<1x8x8xf32>
    %116 = tpu.matmul %111, %113, %cst_45 {dimension_numbers = #tpu.dot_dimension_numbers<[2], [2], [1], [1], [0, 0, 0, 1, 1, 1], [0], [0]>} : vector<1x8x8xbf16>, vector<1x8x8xbf16>, vector<1x8x8xf32> -> vector<1x8x8xf32>
    "tpu.trace_stop"() : () -> ()
    %117 = arith.addf %116, %32 : vector<1x8x8xf32>
    %cst_46 = arith.constant dense<0xFF800000> : vector<1x8xf32>
    %118 = vector.multi_reduction <maximumf>, %117, %cst_46 [2] : vector<1x8x8xf32> to vector<1x8xf32>
    %119 = vector.shape_cast %118 : vector<1x8xf32> to vector<1x8x1xf32>
    %120 = vector.broadcast %119 : vector<1x8x1xf32> to vector<1x8x8xf32>
    %121 = arith.subf %117, %120 : vector<1x8x8xf32>
    %122 = math.exp %121 : vector<1x8x8xf32>
    %cst_47 = arith.constant dense<0.000000e+00> : vector<1x8xf32>
    %123 = vector.multi_reduction <add>, %122, %cst_47 [2] : vector<1x8x8xf32> to vector<1x8xf32>
    %124 = vector.shape_cast %123 : vector<1x8xf32> to vector<1x8x1xf32>
    %125 = tpu.reciprocal %124 {approx = true} : vector<1x8x1xf32> -> vector<1x8x1xf32>
    %126 = vector.broadcast %125 : vector<1x8x1xf32> to vector<1x8x8xf32>
    %127 = arith.mulf %122, %126 : vector<1x8x8xf32>
    %128 = arith.truncf %127 : vector<1x8x8xf32> to vector<1x8x8xbf16>
    "tpu.trace_start"() <{level = 10 : i32, message = "bqk,bkd->bqd"}> : () -> ()
    %cst_48 = arith.constant dense<0.000000e+00> : vector<1x8x8xf32>
    %129 = tpu.matmul %128, %115, %cst_48 {dimension_numbers = #tpu.dot_dimension_numbers<[2], [1], [1], [2], [0, 0, 0, 1, 1, 2], [0], [0]>} : vector<1x8x8xbf16>, vector<1x8x8xbf16>, vector<1x8x8xf32> -> vector<1x8x8xf32>
    "tpu.trace_stop"() : () -> ()
    %130 = vector.shape_cast %129 : vector<1x8x8xf32> to vector<8x8xf32>
    %131 = arith.truncf %130 : vector<8x8xf32> to vector<8x8xbf16>
    %132 = vector.extract_strided_slice %33 {offsets = [24, 0], sizes = [8, 32], strides = [1, 1]} : vector<32x32xbf16> to vector<8x32xbf16>
    %cst_49 = arith.constant dense<0.000000e+00> : vector<8x32xf32>
    %133 = tpu.matmul %131, %132, %cst_49 {dimension_numbers = #tpu.dot_dimension_numbers<[1], [0], [0], [1], [0, 0, 1, 1], [], []>} : vector<8x8xbf16>, vector<8x32xbf16>, vector<8x32xf32> -> vector<8x32xf32>
    %134 = arith.addf %109, %133 : vector<8x32xf32>
    %c0_50 = arith.constant 0 : index
    %c0_51 = arith.constant 0 : index
    %135 = vector.load %arg12[%c0_50, %c0_51] : memref<1x32xf32, #tpu.memory_space<vmem>>, vector<1x32xf32>
    %136 = vector.broadcast %135 : vector<1x32xf32> to vector<8x32xf32>
    %137 = arith.addf %134, %136 : vector<8x32xf32>
    %138 = arith.addf %137, %1 : vector<8x32xf32>
    %cst_52 = arith.constant dense<0.000000e+00> : vector<8xf32>
    %139 = vector.multi_reduction <add>, %138, %cst_52 [1] : vector<8x32xf32> to vector<8xf32>
    %140 = vector.shape_cast %139 : vector<8xf32> to vector<8x1xf32>
    %cst_53 = arith.constant 3.200000e+01 : f32
    %141 = vector.broadcast %cst_53 : f32 to vector<8x1xf32>
    %142 = arith.divf %140, %141 : vector<8x1xf32>
    %143 = vector.broadcast %142 : vector<8x1xf32> to vector<8x32xf32>
    %144 = arith.subf %138, %143 : vector<8x32xf32>
    %145 = arith.mulf %144, %144 : vector<8x32xf32>
    %cst_54 = arith.constant dense<0.000000e+00> : vector<8xf32>
    %146 = vector.multi_reduction <add>, %145, %cst_54 [1] : vector<8x32xf32> to vector<8xf32>
    %147 = vector.shape_cast %146 : vector<8xf32> to vector<8x1xf32>
    %cst_55 = arith.constant 3.200000e+01 : f32
    %148 = vector.broadcast %cst_55 : f32 to vector<8x1xf32>
    %149 = arith.divf %147, %148 : vector<8x1xf32>
    %cst_56 = arith.constant 9.99999974E-6 : f32
    %150 = vector.broadcast %cst_56 : f32 to vector<8x1xf32>
    %151 = arith.addf %149, %150 : vector<8x1xf32>
    %152 = math.rsqrt %151 : vector<8x1xf32>
    %153 = vector.broadcast %152 : vector<8x1xf32> to vector<8x32xf32>
    %154 = arith.mulf %144, %153 : vector<8x32xf32>
    %c0_57 = arith.constant 0 : index
    %c0_58 = arith.constant 0 : index
    %155 = vector.load %arg13[%c0_57, %c0_58] : memref<1x32xf32, #tpu.memory_space<vmem>>, vector<1x32xf32>
    %156 = vector.broadcast %155 : vector<1x32xf32> to vector<8x32xf32>
    %157 = arith.mulf %154, %156 : vector<8x32xf32>
    %c0_59 = arith.constant 0 : index
    %c0_60 = arith.constant 0 : index
    %158 = vector.load %arg14[%c0_59, %c0_60] : memref<1x32xf32, #tpu.memory_space<vmem>>, vector<1x32xf32>
    %159 = vector.broadcast %158 : vector<1x32xf32> to vector<8x32xf32>
    %160 = arith.addf %157, %159 : vector<8x32xf32>
    %161 = vector.shape_cast %160 : vector<8x32xf32> to vector<1x8x32xf32>
    %c0_61 = arith.constant 0 : index
    %c0_62 = arith.constant 0 : index
    %c0_63 = arith.constant 0 : index
    %162 = vector.load %arg15[%c0_61, %c0_62, %c0_63] : memref<1x8x32xf32, #tpu.memory_space<vmem>>, vector<1x8x32xf32>
    tpu.vector_store %arg15[%c0_61, %c0_62, %c0_63], %161 {strides = array<i32>} : memref<1x8x32xf32, #tpu.memory_space<vmem>>, vector<1x8x32xf32>,
    return
  }
  func.func @transform_0(%arg0: i32) -> (i32, i32, i32) {
    %c0_i32 = arith.constant 0 : i32
    %c0_i32_0 = arith.constant 0 : i32
    %c0_i32_1 = arith.constant 0 : i32
    return %arg0, %c0_i32, %c0_i32_0 : i32, i32, i32
  }
  func.func @transform_1(%arg0: i32) -> (i32, i32, i32) {
    %c0_i32 = arith.constant 0 : i32
    %c0_i32_0 = arith.constant 0 : i32
    %c0_i32_1 = arith.constant 0 : i32
    return %arg0, %c0_i32, %c0_i32_0 : i32, i32, i32
  }
  func.func @transform_2(%arg0: i32) -> (i32, i32, i32) {
    %c0_i32 = arith.constant 0 : i32
    %c0_i32_0 = arith.constant 0 : i32
    %c0_i32_1 = arith.constant 0 : i32
    return %arg0, %c0_i32, %c0_i32_0 : i32, i32, i32
  }
  func.func @transform_3(%arg0: i32) -> (i32, i32, i32) {
    %c0_i32 = arith.constant 0 : i32
    %c0_i32_0 = arith.constant 0 : i32
    %c0_i32_1 = arith.constant 0 : i32
    return %arg0, %c0_i32, %c0_i32_0 : i32, i32, i32
  }
  func.func @transform_4(%arg0: i32) -> (i32, i32) {
    %c0_i32 = arith.constant 0 : i32
    %c0_i32_0 = arith.constant 0 : i32
    %c0_i32_1 = arith.constant 0 : i32
    return %c0_i32, %c0_i32_0 : i32, i32
  }
  func.func @transform_5(%arg0: i32) -> (i32, i32) {
    %c0_i32 = arith.constant 0 : i32
    %c0_i32_0 = arith.constant 0 : i32
    %c0_i32_1 = arith.constant 0 : i32
    return %c0_i32, %c0_i32_0 : i32, i32
  }
  func.func @transform_6(%arg0: i32) -> (i32, i32) {
    %c0_i32 = arith.constant 0 : i32
    %c0_i32_0 = arith.constant 0 : i32
    %c0_i32_1 = arith.constant 0 : i32
    return %c0_i32, %c0_i32_0 : i32, i32
  }
  func.func @transform_7(%arg0: i32) -> (i32, i32) {
    %c0_i32 = arith.constant 0 : i32
    %c0_i32_0 = arith.constant 0 : i32
    %c0_i32_1 = arith.constant 0 : i32
    return %c0_i32, %c0_i32_0 : i32, i32
  }
  func.func @transform_8(%arg0: i32) -> (i32, i32) {
    %c0_i32 = arith.constant 0 : i32
    %c0_i32_0 = arith.constant 0 : i32
    %c0_i32_1 = arith.constant 0 : i32
    return %c0_i32, %c0_i32_0 : i32, i32
  }
  func.func @transform_9(%arg0: i32) -> (i32, i32) {
    %c0_i32 = arith.constant 0 : i32
    %c0_i32_0 = arith.constant 0 : i32
    %c0_i32_1 = arith.constant 0 : i32
    return %c0_i32, %c0_i32_0 : i32, i32
  }
  func.func @transform_10(%arg0: i32) -> (i32, i32) {
    %c0_i32 = arith.constant 0 : i32
    %c0_i32_0 = arith.constant 0 : i32
    %c0_i32_1 = arith.constant 0 : i32
    return %c0_i32, %c0_i32_0 : i32, i32
  }
  func.func @transform_11(%arg0: i32) -> (i32, i32) {
    %c0_i32 = arith.constant 0 : i32
    %c0_i32_0 = arith.constant 0 : i32
    %c0_i32_1 = arith.constant 0 : i32
    return %c0_i32, %c0_i32_0 : i32, i32
  }
  func.func @transform_12(%arg0: i32) -> (i32, i32) {
    %c0_i32 = arith.constant 0 : i32
    %c0_i32_0 = arith.constant 0 : i32
    %c0_i32_1 = arith.constant 0 : i32
    return %c0_i32, %c0_i32_0 : i32, i32
  }
  func.func @transform_13(%arg0: i32) -> (i32, i32) {
    %c0_i32 = arith.constant 0 : i32
    %c0_i32_0 = arith.constant 0 : i32
    %c0_i32_1 = arith.constant 0 : i32
    return %c0_i32, %c0_i32_0 : i32, i32
  }
  func.func @transform_14(%arg0: i32) -> (i32, i32, i32) {
    %c0_i32 = arith.constant 0 : i32
    %c0_i32_0 = arith.constant 0 : i32
    %c0_i32_1 = arith.constant 0 : i32
    return %arg0, %c0_i32, %c0_i32_0 : i32, i32, i32
  }
}

</mosaic_0001>

<bundles_post_ra>
// kernel: tpu_custom_call.1
= control target key start
LH: loop header
LB: loop body
LE: loop exit
PB: predicated region body
PF: predicated region fallthrough
CT: control target
= control target key end

     0   :  { %s2898_s0 = inlined_call_operand.hbm [shape: f32[4,8,32], index: 0, kind: input, shape index: {}]   ;;  %s2899_s1 = inlined_call_operand.hbm [shape: f32[4,8,32], index: 1, kind: input, shape index: {}]   ;;  %s2900_s2 = inlined_call_operand.hbm [shape: f32[4,8,32], index: 2, kind: input, shape index: {}]   ;;  %s2901_s3 = inlined_call_operand.hbm [shape: s8[4,8,8], index: 3, kind: input, shape index: {}]   ;;  %s2902_s4 = inlined_call_operand.hbm [shape: bf16[32,32], index: 4, kind: input, shape index: {}]   ;;  %s2903_s5 = inlined_call_operand.vmem [shape: f32[1,32], index: 5, kind: input, shape index: {}]   ;;  %s2904_s6 = inlined_call_operand.vmem [shape: bf16[32,32], index: 6, kind: input, shape index: {}]   ;;  %s2905_s7 = inlined_call_operand.vmem [shape: f32[1,32], index: 7, kind: input, shape index: {}]   ;;  %s2906_s8 = inlined_call_operand.hbm [shape: bf16[32,32], index: 8, kind: input, shape index: {}]   ;;  %s2907_s9 = inlined_call_operand.hbm [shape: f32[1,32], index: 9, kind: input, shape index: {}]   ;;  %s2908_s10 = inlined_call_operand.vmem [shape: bf16[32,32], index: 10, kind: input, shape index: {}]   ;;  %s2909_s11 = inlined_call_operand.vmem [shape: f32[1,32], index: 11, kind: input, shape index: {}]   ;;  %s2910_s12 = inlined_call_operand.vmem [shape: f32[1,32], index: 12, kind: input, shape index: {}]   ;;  %s2911_s13 = inlined_call_operand.vmem [shape: f32[1,32], index: 13, kind: input, shape index: {}]   ;;  %s2912_s14 = inlined_call_operand.hbm [shape: f32[4,8,32], index: 14, kind: output, shape index: {}]  }
   0x1   :  { %2932 = sst [smem:[#allocation27_spill]] %s2899_s1 }
   0x2   :  { %2933 = sst [smem:[#allocation28_spill]] %s2902_s4 }
   0x3   :  { %2934 = sst [smem:[#allocation29_spill]] %s2906_s8 }
   0x4   :  { %2935 = sst [smem:[#allocation30_spill]] %s2908_s10 }
   0x5   :  { %2936 = sst [smem:[#allocation31_spill]] %s2909_s11 }
   0x6   :  { %2937 = sst [smem:[#allocation32_spill]] %s2910_s12 }
   0x7   :  { %2938 = sst [smem:[#allocation33_spill]] %s2911_s13 }
   0x8   :  { %2939 = sst [smem:[#allocation34_spill]] %s2912_s14 }
   0x9   :  { %19 = vsyncpa [#allocation3], 0 }
   0xa   :  { %21 = vsyncpa [#allocation3 + $0x1], 0 }
   0xb   :  { %22 = vsyncpa [#allocation6], 0 }
   0xc   :  { %24 = vsyncpa [#allocation6 + $0x1], 0 }
   0xd   :  { %25 = vsyncpa [#allocation9], 0 }
   0xe   :  { %27 = vsyncpa [#allocation9 + $0x1], 0 }
   0xf   :  { %28 = vsyncpa [#allocation12], 0 }
  0x10   :  { %29 = vsyncpa [#allocation4], 0 }
  0x11   :  { %31 = vsyncpa [#allocation4 + $0x1], 0  ;;  %s2381_s29 = smov 0   ;;  %s2383_s30 = smov 0  }
  0x12   :  { %s2385_s15 = smov 0   ;;  %s2387_s16 = smov 0  }
  0x13 LB: > { %2940 = sst [smem:[#allocation21_spill]] %s2277_s29  ;;  %s2402_s17 = sadd.s32 4294967295, %s2289_s16   ;;  %s2289_s16 = sphi %s2387_s16, %s2981_s16   ;;  %s2285_s15 = sphi %s2385_s15, %s2983_s15   ;;  %s2281_s30 = sphi %s2383_s30, %s2985_s30   ;;  %s2277_s29 = sphi %s2381_s29, %s2984_s29  }
  0x14   : > { %2941 = sst [smem:[#allocation22_spill]] %s2285_s15  ;;  %s1697_s18 = sadd.s32 4294967294, %s2289_s16  }
  0x15   : > { %p57_p0 = scmp.ne.s32.totalorder %s2281_s30, %s2277_s29  ;;  %p2916_p1 = scmp.eq.s32.totalorder %s2402_s17, 0 }
  0x16   : > { %p375_p3 = scmp.eq.s32.totalorder %s1697_s18, 3  ;;  %p1698_p5 = scmp.ge.s32.totalorder %s2289_s16, 1 }
  0x17   : > { %p2411_p4 = por %p2916_p1, %p57_p0  ;;  %p382_p7 = scmp.lt.s32.totalorder %s2289_s16, 5 }
  0x18   : > { %p2416_p6 = por %p375_p3, %p57_p0  ;;  %s2291_s22 = smov [#allocation10]  }
  0x19   : > { %s2942_s19 = scalar_select %p2411_p4, 1, 0 }
  0x1a   : > { %s2943_s20 = scalar_select %p2416_p6, 1, 0 }
  0x1b   : > { %p2421_p8 = pnand %p1698_p5, %p382_p7  ;;  %s394_s23 = sshll.u32 %s2291_s22, 4  ;;  %s395_s23 = int_to_ptr.vmem [resolvable:$true] %s394_s23 }
  0x1c   : > { %2944 = sst [smem:[#allocation23_spill]] %s2943_s20  ;;  %s2292_s25 = smov [#allocation11]  }
  0x1d   : > { %s2945_s21 = scalar_select %p2421_p8, 1, 0 }
  0x1e   : > { %p1902_p9 = pneg %p2421_p8  ;;  %s416_s26 = sshll.u32 %s2292_s25, 4  ;;  %s2433_s26 = int_to_ptr.vmem [resolvable:$true] %s416_s26 }
  0x1f   : > { %s2947_s4 = sld [smem:[#allocation28_spill]] }
  0x20   : > { %p2429_p10 = pnand %p1902_p9, %p2916_p1 }
  0x22   : > { %s2946_s24 = scalar_select %p2429_p10, 1, 0 }
  0x23   : > { %p2443_p12 = pneg %p2429_p10 }
  0x25   : > { %s2003_s18 = scalar_lea.hbm %s2947_s4, 256 }
  0x26   : > { %p2004_p11 = scmp.ne.s32.totalorder %s2947_s4, %s2003_s18  ;;  %p2010_p3 = scmp.lt.u32.totalorder %s2003_s18, %s2947_s4 }
  0x27   : > { %s2948_s22 = scalar_select %p2443_p12, 1, 0 }
  0x28   : > { %p2006_p13 = pnand %p2443_p12, %p2004_p11 }
  0x2a   : > { %p2007_p0 = pneg %p2006_p13 }
  0x2c   : > { %p2012_p5 = pnand %p2010_p3, %p2007_p0 }
  0x2e   : > { %2015 = shalt.err (!%p2012_p5)
}
  0x2f   : > { %s2016_s27 = scalar_lea.vmem %s395_s23, 256  ;;  %p2024_p2 = scmp.lt.s32.totalorder %s395_s23, %s395_s23 }
  0x30   : > { %p2017_p7 = scmp.ne.s32.totalorder %s395_s23, %s2016_s27  ;;  %p2025_p6 = scmp.lt.s32.totalorder %s2016_s27, %s2016_s27 }
  0x32   : > { %p2019_p9 = pnand %p2017_p7, %p2443_p12  ;;  %p2026_p4 = por %p2025_p6, %p2024_p2 }
  0x34   : > { %p2020_p1 = pneg %p2019_p9 }
  0x36   : > { %p2027_p8 = pnand %p2026_p4, %p2020_p1 }
  0x38   : > { %2030 = shalt.err (!%p2027_p8)
}
  0x39   : > { %s2293_s29 = smov 64   ;;  %s2294_s20 = smov 4  }
  0x3a   : > { %1905 = dma.hbm_to_vmem [thread:$0]  (!%p2429_p10), %s2947_s4, 256, %s395_s23, [#allocation9], %s2293_s29, %s2293_s29, %s2294_s20  }
  0x3b   : > { %s2949_s8 = sld [smem:[#allocation29_spill]] }
  0x41   : > { %s2031_s13 = scalar_lea.hbm %s2949_s8, 256 }
  0x42   : > { %p2032_p11 = scmp.ne.s32.totalorder %s2949_s8, %s2031_s13  ;;  %p2038_p4 = scmp.lt.u32.totalorder %s2031_s13, %s2949_s8 }
  0x44   : > { %p2034_p1 = pnand %p2032_p11, %p2443_p12 }
  0x46   : > { %p2035_p2 = pneg %p2034_p1 }
  0x48   : > { %p2040_p6 = pnand %p2038_p4, %p2035_p2 }
  0x4a   : > { %2043 = shalt.err (!%p2040_p6)
}
  0x4b   : > { %s2044_s23 = scalar_lea.vmem %s2433_s26, 256  ;;  %p2052_p3 = scmp.lt.s32.totalorder %s2433_s26, %s2433_s26 }
  0x4c   : > { %p2045_p8 = scmp.ne.s32.totalorder %s2433_s26, %s2044_s23  ;;  %p2053_p5 = scmp.lt.s32.totalorder %s2044_s23, %s2044_s23 }
  0x4e   : > { %p2047_p13 = pnand %p2045_p8, %p2443_p12  ;;  %p2054_p7 = por %p2053_p5, %p2052_p3 }
  0x50   : > { %p2048_p0 = pneg %p2047_p13 }
  0x52   : > { %p2055_p9 = pnand %p2054_p7, %p2048_p0 }
  0x54   : > { %2058 = shalt.err (!%p2055_p9)
}
  0x55   : > { %1908 = dma.hbm_to_vmem [thread:$0]  (!%p2429_p10), %s2949_s8, 256, %s2433_s26, [#allocation12], %s2293_s29, %s2293_s29, %s2294_s20  }
  0x56   : > { %s2483_s12 = sadd.s32 1, %s2289_s16   ;;  %s44_s13 = sadd.s32 1, %s2285_s15 }
  0x57   : > { %2950 = sst [smem:[#allocation24_spill]] %s2483_s12  ;;  %s41_s14 = ssub.s32 %s2289_s16, %s2483_s12 }
  0x58   : > { %p51_p11 = scmp.ne.s32.totalorder %s2285_s15, %s2281_s30  ;;  %p42_p1 = scmp.eq.s32.totalorder %s41_s14, 0 }
  0x59   : > { %p52_p2 = scmp.eq.s32.totalorder %s2289_s16, 0  ;;  %p2951_p4 = scmp.eq.s32.totalorder %s2402_s17, 3 }
  0x5a   : > { %p1932_p8 = scmp.lt.s32.totalorder %s2289_s16, 4  ;;  %s2502_s25 = sand.u32 1, %s2285_s15  }
  0x5b   : > { %p2493_p6 = por %p2951_p4, %p51_p11  ;;  %p53_p13 = por %p52_p2, %p51_p11 }
  0x5c   : > { %s2499_s18 = scalar_select %p42_p1, %s2285_s15, %s44_s13  }
  0x5d   : > { %s2952_s28 = scalar_select %p2493_p6, 1, 0 }
  0x5e   : > { %2954 = sst [smem:[#allocation26_spill]] %s2499_s18  ;;  %s2505_s26 = sshll.u32 %s2502_s25, 3 }
  0x5f   : > { %2953 = sst [smem:[#allocation25_spill]] %s2952_s28  ;;  %s2508_s29 = sshll.u32 %s2289_s16, 7 }
  0x60   : > { %p2510_p0 = pnand %p1932_p8, %p53_p13  ;;  %s2923_s27 = sand.u32 1, %s2289_s16  }
  0x61   : > { %s2956_s1 = sld [smem:[#allocation27_spill]]  ;;  %s475_s13 = scalar_lea.vmem [#allocation5], %s2505_s26 }
  0x62   : > { %s2955_s20 = scalar_select %p2510_p0, 1, 0 }
  0x63   : > { %s482_s14 = sshll.u32 %s475_s13, 4  ;;  %s2526_s4 = scalar_lea.sflag [#allocation6], %s2923_s27  ;;  %s2522_s14 = int_to_ptr.vmem [resolvable:$true] %s482_s14 }
  0x64   : > { %p2532_p5 = pneg %p2510_p0 }
  0x67   : > { %s2519_s11 = scalar_lea.hbm %s2956_s1, %s2508_s29  ;;  %s2064_s13 = scalar_lea.hbm %s2956_s1, 512 }
  0x68   : > { %s2059_s8 = scalar_lea.hbm %s2519_s11, 128  ;;  %p2065_p11 = scmp.lt.u32.totalorder %s2519_s11, %s2956_s1 }
  0x69   : > { %p2060_p3 = scmp.ne.s32.totalorder %s2519_s11, %s2059_s8  ;;  %p2066_p1 = scmp.lt.u32.totalorder %s2064_s13, %s2059_s8 }
  0x6a   : > { %p2068_p4 = scmp.lt.u32.totalorder %s2059_s8, %s2519_s11 }
  0x6b   : > { %p2062_p7 = pnand %p2532_p5, %p2060_p3  ;;  %p2067_p2 = por %p2066_p1, %p2065_p11 }
  0x6d   : > { %p2063_p9 = pneg %p2062_p7  ;;  %p2069_p8 = por %p2068_p4, %p2067_p2 }
  0x6f   : > { %p2070_p13 = pnand %p2069_p8, %p2063_p9 }
  0x71   : > { %2073 = shalt.err (!%p2070_p13)
}
  0x72   : > { %s2074_s27 = scalar_lea.vmem %s2522_s14, 128  ;;  %s2295_s23 = smov [#allocation5]  }
  0x73   : > { %p2075_p3 = scmp.ne.s32.totalorder %s2522_s14, %s2074_s27  ;;  %s2079_s10 = sshll.u32 %s2295_s23, 4  ;;  %s2080_s10 = int_to_ptr.vmem [resolvable:$false] %s2079_s10 }
  0x74   : > { %s2081_s15 = scalar_lea.vmem %s2080_s10, 256  ;;  %p2082_p10 = scmp.lt.s32.totalorder %s2522_s14, %s2080_s10 }
  0x75   : > { %p2077_p7 = pnand %p2075_p3, %p2532_p5  ;;  %p2083_p12 = scmp.lt.s32.totalorder %s2081_s15, %s2074_s27 }
  0x77   : > { %p2078_p6 = pneg %p2077_p7  ;;  %p2084_p11 = por %p2083_p12, %p2082_p10 }
  0x79   : > { %p2085_p1 = pnand %p2084_p11, %p2078_p6 }
  0x7b   : > { %2088 = shalt.err (!%p2085_p1)
}
  0x7c   : > { %1918 = dma.hbm_to_vmem [thread:$0]  (!%p2510_p0), %s2519_s11, 128, %s2522_s14, %s2526_s4  }
  0x7d   : > { %s2296_s8 = smov [#allocation13]   ;;  %s2089_s23 = scalar_lea.hbm %s2907_s9, 16 }
  0x7e   : > { %s430_s12 = sshll.u32 %s2296_s8, 4  ;;  %p2090_p10 = scmp.ne.s32.totalorder %s2907_s9, %s2089_s23  ;;  %s431_s12 = int_to_ptr.vmem [resolvable:$true] %s430_s12 }
  0x7f   : > { %p2958_p12 = scmp.ne.s32.totalorder %s2948_s22, 0  ;;  %p2096_p2 = scmp.lt.u32.totalorder %s2089_s23, %s2907_s9 }
  0x81   : > { %p2092_p6 = pnand %p2090_p10, %p2958_p12 }
  0x83   : > { %p2093_p9 = pneg %p2092_p6 }
  0x85   : > { %p2098_p4 = pnand %p2096_p2, %p2093_p9 }
  0x87   : > { %2101 = shalt.err (!%p2098_p4)
}
  0x88   : > { %s2102_s11 = scalar_lea.vmem %s431_s12, 16  ;;  %s2109_s1 = scalar_lea.vmem %s431_s12, 32 }
  0x89   : > { %p2103_p8 = scmp.ne.s32.totalorder %s431_s12, %s2102_s11  ;;  %p2110_p7 = scmp.lt.s32.totalorder %s431_s12, %s431_s12 }
  0x8a   : > { %p2111_p11 = scmp.lt.s32.totalorder %s2109_s1, %s2102_s11 }
  0x8b   : > { %p2105_p13 = pnand %p2103_p8, %p2958_p12 }
  0x8c   : > { %p2112_p1 = por %p2111_p11, %p2110_p7 }
  0x8d   : > { %p2106_p3 = pneg %p2105_p13 }
  0x8f   : > { %p2113_p0 = pnand %p2112_p1, %p2106_p3 }
  0x91   : > { %2116 = shalt.err (!%p2113_p0)
}
  0x92   : > { %p2959_p10 = scmp.ne.s32.totalorder %s2946_s24, 0  ;;  %s2578_s13 = scalar_lea.hbm %s2898_s0, %s2508_s29 }
  0x93   : > { %s457_s23 = scalar_lea.vmem [#allocation2], %s2505_s26  ;;  %s454_s24 = scalar_lea.sflag [#allocation3], %s2502_s25 }
  0x94   : > { %1911 = dma.hbm_to_vmem [thread:$0]  (!%p2959_p10), %s2907_s9, 16, %s431_s12, [#allocation12]  }
  0x95   : > { %s464_s10 = sshll.u32 %s457_s23, 4  ;;  %s2117_s27 = scalar_lea.hbm %s2578_s13, 128  ;;  %s465_s10 = int_to_ptr.vmem [resolvable:$true] %s464_s10 }
  0x96   : > { %p2118_p0 = scmp.ne.s32.totalorder %s2578_s13, %s2117_s27  ;;  %s2122_s11 = scalar_lea.hbm %s2898_s0, 512 }
  0x97   : > { %p2123_p9 = scmp.lt.u32.totalorder %s2578_s13, %s2898_s0  ;;  %p2124_p2 = scmp.lt.u32.totalorder %s2122_s11, %s2117_s27 }
  0x98   : > { %p2120_p12 = pnand %p2118_p0, %p2532_p5  ;;  %p2126_p8 = scmp.lt.u32.totalorder %s2117_s27, %s2578_s13 }
  0x99   : > { %p2125_p4 = por %p2124_p2, %p2123_p9 }
  0x9a   : > { %p2121_p6 = pneg %p2120_p12 }
  0x9b   : > { %p2127_p13 = por %p2126_p8, %p2125_p4 }
  0x9d   : > { %p2128_p3 = pnand %p2127_p13, %p2121_p6 }
  0x9f   : > { %2131 = shalt.err (!%p2128_p3)
}
  0xa0   : > { %s2132_s14 = scalar_lea.vmem %s465_s10, 128  ;;  %s2297_s8 = smov [#allocation2]  }
  0xa1   : > { %p2133_p7 = scmp.ne.s32.totalorder %s465_s10, %s2132_s14  ;;  %s2137_s22 = sshll.u32 %s2297_s8, 4  ;;  %s2138_s22 = int_to_ptr.vmem [resolvable:$false] %s2137_s22 }
  0xa2   : > { %s2139_s23 = scalar_lea.vmem %s2138_s22, 256  ;;  %p2140_p10 = scmp.lt.s32.totalorder %s465_s10, %s2138_s22 }
  0xa3   : > { %p2135_p11 = pnand %p2133_p7, %p2532_p5  ;;  %p2141_p0 = scmp.lt.s32.totalorder %s2139_s23, %s2132_s14 }
  0xa5   : > { %p2136_p1 = pneg %p2135_p11  ;;  %p2142_p12 = por %p2141_p0, %p2140_p10 }
  0xa7   : > { %p2143_p2 = pnand %p2142_p12, %p2136_p1 }
  0xa9   : > { %2146 = shalt.err (!%p2143_p2)
}
  0xaa   : > { %p2960_p9 = scmp.ne.s32.totalorder %s2955_s20, 0  ;;  %s2603_s12 = scalar_lea.hbm %s2900_s2, %s2508_s29 }
  0xab   : > { %s493_s11 = scalar_lea.vmem [#allocation7], %s2505_s26  ;;  %s1709_s28 = sshll.u32 %s2502_s25, 1 }
  0xac   : > { %1915 = dma.hbm_to_vmem [thread:$0]  (!%p2960_p9), %s2578_s13, 128, %s465_s10, %s454_s24  }
  0xad   : > { %s500_s1 = sshll.u32 %s493_s11, 4  ;;  %s2147_s14 = scalar_lea.hbm %s2603_s12, 128  ;;  %s501_s1 = int_to_ptr.vmem [resolvable:$true] %s500_s1 }
  0xae   : > { %p2148_p6 = scmp.ne.s32.totalorder %s2603_s12, %s2147_s14  ;;  %s2152_s10 = scalar_lea.hbm %s2900_s2, 512 }
  0xaf   : > { %p2153_p13 = scmp.lt.u32.totalorder %s2603_s12, %s2900_s2  ;;  %p2154_p3 = scmp.lt.u32.totalorder %s2152_s10, %s2147_s14 }
  0xb0   : > { %p2150_p4 = pnand %p2148_p6, %p2532_p5  ;;  %p2156_p11 = scmp.lt.u32.totalorder %s2147_s14, %s2603_s12 }
  0xb1   : > { %p2155_p7 = por %p2154_p3, %p2153_p13 }
  0xb2   : > { %p2151_p8 = pneg %p2150_p4 }
  0xb3   : > { %p2157_p1 = por %p2156_p11, %p2155_p7 }
  0xb5   : > { %p2158_p10 = pnand %p2157_p1, %p2151_p8 }
  0xb7   : > { %2161 = shalt.err (!%p2158_p10)
}
  0xb8   : > { %s2162_s26 = scalar_lea.vmem %s501_s1, 128  ;;  %s2298_s22 = smov [#allocation7]  }
  0xb9   : > { %p2163_p0 = scmp.ne.s32.totalorder %s501_s1, %s2162_s26  ;;  %s2167_s23 = sshll.u32 %s2298_s22, 4  ;;  %s2168_s23 = int_to_ptr.vmem [resolvable:$false] %s2167_s23 }
  0xba   : > { %s2169_s27 = scalar_lea.vmem %s2168_s23, 256  ;;  %p2170_p6 = scmp.lt.s32.totalorder %s501_s1, %s2168_s23 }
  0xbb   : > { %p2165_p12 = pnand %p2163_p0, %p2532_p5  ;;  %p2171_p4 = scmp.lt.s32.totalorder %s2169_s27, %s2162_s26 }
  0xbd   : > { %p2166_p2 = pneg %p2165_p12  ;;  %p2172_p9 = por %p2171_p4, %p2170_p6 }
  0xbf   : > { %p2173_p3 = pnand %p2172_p9, %p2166_p2 }
  0xc1   : > { %2176 = shalt.err (!%p2173_p3)
}
  0xc2   : > { %p2961_p13 = scmp.ne.s32.totalorder %s2955_s20, 0  ;;  %s1710_s15 = sshll.u32 %s2289_s16, 5 }
  0xc3   : > { %s2629_s8 = scalar_lea.hbm %s2901_s3, %s1710_s15  ;;  %s511_s13 = scalar_lea.vmem [#allocation8], %s1709_s28 }
  0xc4   : > { %1921 = dma.hbm_to_vmem [thread:$0]  (!%p2961_p13), %s2603_s12, 128, %s501_s1, %s2526_s4  }
  0xc5   : > { %s518_s10 = sshll.u32 %s511_s13, 4  ;;  %s2962_s24 = sand.u32 1, %s2289_s16   ;;  %s519_s10 = int_to_ptr.vmem [resolvable:$true] %s518_s10 }
  0xc6   : > { %s508_s29 = scalar_lea.sflag [#allocation9], %s2962_s24  ;;  %s2177_s26 = scalar_lea.hbm %s2629_s8, 32 }
  0xc7   : > { %p2178_p9 = scmp.ne.s32.totalorder %s2629_s8, %s2177_s26  ;;  %s2182_s1 = scalar_lea.hbm %s2901_s3, 128 }
  0xc8   : > { %p2183_p11 = scmp.lt.u32.totalorder %s2629_s8, %s2901_s3  ;;  %p2184_p1 = scmp.lt.u32.totalorder %s2182_s1, %s2177_s26 }
  0xc9   : > { %p2180_p8 = pnand %p2178_p9, %p2532_p5  ;;  %p2186_p0 = scmp.lt.u32.totalorder %s2177_s26, %s2629_s8 }
  0xca   : > { %p2185_p10 = por %p2184_p1, %p2183_p11 }
  0xcb   : > { %p2181_p7 = pneg %p2180_p8 }
  0xcc   : > { %p2187_p12 = por %p2186_p0, %p2185_p10 }
  0xce   : > { %p2188_p2 = pnand %p2187_p12, %p2181_p7 }
  0xd0   : > { %2191 = shalt.err (!%p2188_p2)
}
  0xd1   : > { %s2192_s28 = scalar_lea.vmem %s519_s10, 32  ;;  %s2299_s23 = smov [#allocation8]  }
  0xd2   : > { %p2193_p6 = scmp.ne.s32.totalorder %s519_s10, %s2192_s28  ;;  %s2197_s27 = sshll.u32 %s2299_s23, 4  ;;  %s2198_s27 = int_to_ptr.vmem [resolvable:$false] %s2197_s27 }
  0xd3   : > { %s2199_s15 = scalar_lea.vmem %s2198_s27, 64  ;;  %p2200_p9 = scmp.lt.s32.totalorder %s519_s10, %s2198_s27 }
  0xd4   : > { %p2195_p4 = pnand %p2193_p6, %p2532_p5  ;;  %p2201_p8 = scmp.lt.s32.totalorder %s2199_s15, %s2192_s28 }
  0xd6   : > { %p2196_p3 = pneg %p2195_p4  ;;  %p2202_p13 = por %p2201_p8, %p2200_p9 }
  0xd8   : > { %p2203_p1 = pnand %p2202_p13, %p2196_p3 }
  0xda   : > { %2206 = shalt.err (!%p2203_p1)
}
  0xdb   : > { %p2963_p11 = scmp.ne.s32.totalorder %s2955_s20, 0  ;;  %p2964_p7 = scmp.ne.s32.totalorder %s2945_s21, 0 }
  0xdc   : > { %s2655_s18 = sand.u32 (!%p2964_p7), 1, %s2281_s30   ;;  %p2965_p5 = scmp.ne.s32.totalorder (!%p2964_p7), %s2942_s19, 0 }
  0xdd   : > { %1924 = dma.hbm_to_vmem [thread:$0]  (!%p2963_p11), %s2629_s8, 32, %s519_s10, %s508_s29  }
  0xde   : > { %527 = sbr.rel (%p2964_p7) target bundleno = 3171 (0xc63), region = 76  ;;  %s2658_s11 = sshll.u32 (!%p2964_p7), %s2655_s18, 3 }
  0xdf   : > { %s530_s14 = scalar_lea.sflag (!%p2964_p7), [#allocation3], %s2655_s18  ;;  %s533_s13 = scalar_lea.vmem (!%p2964_p7), [#allocation2], %s2658_s11 }
  0xe5   : > { %2252 = dma.done.wait (%p2965_p5), %s530_s14, 128  }
  0xe6   : > { %2254 = vsyncadd (%p2965_p5), %s530_s14, 4294967168  ;;  %s538_s21 = sand.u32 1, %s2402_s17   ;;  %s542_s8 = scalar_lea.vmem [#allocation5], %s2658_s11 }
  0xe7   : > { %s539_s20 = scalar_lea.sflag [#allocation6], %s538_s21 }
  0xe8   : > { %2256 = dma.done.wait (%p2965_p5), %s539_s20, 256  }
  0xe9   : > { %2258 = vsyncadd (%p2965_p5), %s539_s20, 4294967040  ;;  %s1715_s10 = sshll.u32 %s2655_s18, 1  ;;  %s551_s24 = scalar_lea.vmem [#allocation7], %s2658_s11 }
  0xea   : > { %s557_s29 = scalar_lea.sflag [#allocation9], %s538_s21  ;;  %s2674_s26 = scalar_lea.vmem [#allocation8], %s1715_s10 }
  0xeb   : > { %2260 = dma.done.wait (%p2965_p5), %s557_s29, 32  }
  0xec   : > { %2262 = vsyncadd (%p2965_p5), %s557_s29, 4294967264  ;;  %p2966_p13 = scmp.eq.s32.totalorder %s2402_s17, 0 }
  0xee   : > { %2264 = dma.done.wait (%p2966_p13), [#allocation9], 256   ;;  %p2967_p10 = pmov %p2966_p13 }
  0xf0   : > { %2266 = vsyncadd (%p2967_p10), [#allocation9], 4294967040  ;;  %p2968_p0 = pmov %p2967_p10 }
  0xf2   : > { %2268 = dma.done.wait (%p2968_p0), [#allocation12], 272   ;;  %p2969_p12 = pmov %p2968_p0 }
  0xf3   : > { %v2300_v0 = vmov 0.0   ;;  %vm2301_vm0 = vmmov 0   ;;  %v1979_v1 = vld [vmem:[%s2904_s6] sm:$0xff]   ;;  %v1980_v2 = vld [vmem:[#allocation10] sm:$0xff]   ;;  %v1981_v3 = vld [vmem:[%s2904_s6 + $0x8] sm:$0xff]   ;;  %vm660_vm1 = vcmask 261120  }
  0xf4   : > { %2270 = vsyncadd (%p2969_p12), [#allocation12], 4294967024  ;;  %1792 = vmatprep.subr.bf16.mxu1 %v2300_v0  ;;  %1784 = vmatprep.subr.bf16.mxu0 %v2300_v0  ;;  %v634_v4 = vld [vmem:[%s542_s8] sm:$0xff]  ;;  %v2704_v6 = vld [vmem:[%s533_s13] sm:$0xff]  ;;  %vm850_vm2 = vcmask 64512   ;;  %s2302_s27 = smov 120  }
  0xf5   : > { %1796 = vmatprep.mubr.msk.bf16.mxu1 %vm2301_vm0, %v2300_v0  ;;  %1788 = vmatprep.mubr.msk.bf16.mxu0 %vm2301_vm0, %v2300_v0  ;;  %v1982_v5 = vld [vmem:[#allocation10 + $0x8] sm:$0xff]   ;;  %v705_v7 = vpack.c.bf16 %v634_v4, %v634_v4  ;;  %v636_v8 = vpack.c.bf16 %v2704_v6, %v2704_v6  ;;  %v1983_v25 = vld [vmem:[#allocation11] sm:$0xff]   ;;  %v1984_v26 = vld [vmem:[#allocation11 + $0x8] sm:$0xff]   ;;  %s2303_s15 = smov 112   ;;  %vm912_vm3 = vcmask 1043456   ;;  %s2970_s21 = sld [smem:[#allocation30_spill]] }
  0xf6   : > { %1793 = vmatpush3.bf16.msra.mxu1 %v1979_v1  ;;  %1785 = vmatpush3.bf16.msra.mxu0 %v1980_v2  ;;  %v1724_v9 = vld [vmem:[%s2905_s7] ss:$0 sm:$0xff]  ;;  %v839_v32 = vld [vmem:[%s2674_s26] sm:$0x3]  ;;  %v1728_v57 = vld [vmem:[#allocation13] ss:$0 sm:$0xff] }
  0xf7   : > { %1794 = vmatprep.subr.bf16.mxu1 %v2300_v0  ;;  %1786 = vmatprep.subr.bf16.mxu0 %v2300_v0  ;;  %v1720_v10 = vld [vmem:[%s2903_s5] ss:$0 sm:$0xff]  ;;  %v840_v33 = vunpack.c.0.s8 %v839_v32  ;;  %s2304_s10 = smov 104   ;;  %s2971_s1 = sld [smem:[#allocation31_spill]] }
  0xf8   : > { %v635_v27 = vld [vmem:[%s551_s24] sm:$0xff]  ;;  %s2972_s22 = sld [smem:[#allocation25_spill]]  ;;  %s2974_s14 = sld [smem:[#allocation33_spill]] }
  0xf9   : > { %v772_v28 = vpack.c.bf16 %v635_v27, %v635_v27  ;;  %v841_v34 = vcvt.s32.f32 %v840_v33  ;;  %s2973_s23 = sld [smem:[#allocation32_spill]]  ;;  %s1748_s13 = sshll.u32 %s2402_s17, 7 }
  0xfa   : > { %1795 = vmatpush3.bf16.msra.mxu1 %v1981_v3  ;;  %1787 = vmatpush3.bf16.msra.mxu0 %v1982_v5  ;;  %s631_s20 = scalar_lea.vmem [#allocation14], %s2658_s11  ;;  %s2975_s29 = sld [smem:[#allocation34_spill]] }
  0xfb   : > { %1808 = vmatprep.subr.bf16.mxu1 %v2300_v0  ;;  %1800 = vmatprep.subr.bf16.mxu0 %v2300_v0  ;;  %v2750_v35 = vmul.f32 -1e+30, %v841_v34  ;;  %s1533_s8 = sshll.u32 %s631_s20, 4  ;;  %s1520_s4 = scalar_lea.sflag [#allocation4], %s2655_s18  ;;  %s2856_s8 = int_to_ptr.vmem [resolvable:$true] %s1533_s8 }
  0xfc   : > { %s2207_s12 = scalar_lea.vmem %s2856_s8, 128  ;;  %s2305_s17 = smov [#allocation14]  }
  0xfd   : > { %1797 = vmatmul.mubr.msk.bf16.vlgmr.msra.gmra.mrb[0].mxu1 %vm660_vm1, %v705_v7  ;;  %1789 = vmatmul.mubr.msk.bf16.vlgmr.msra.gmra.mrb[0].mxu0 %vm660_vm1, %v636_v8  ;;  %v844_v8 = vld [vmem:[%s2970_s21 + $0x4] sm:$0xf]  ;;  %p2208_p2 = scmp.ne.s32.totalorder %s2856_s8, %s2207_s12  ;;  %s2211_s11 = sshll.u32 %s2305_s17, 4  ;;  %s2212_s11 = int_to_ptr.vmem [resolvable:$false] %s2211_s11 }
  0xfe   : > { %1810 = vmatprep.mubr.msk.bf16.mxu1 %vm2301_vm0, %v2300_v0  ;;  %1804 = vmatprep.mubr.msk.bf16.mxu0 %vm2301_vm0, %v2300_v0  ;;  %p2977_p6 = scmp.ne.s32.totalorder %s2972_s22, 0  ;;  %p2214_p9 = scmp.lt.s32.totalorder %s2856_s8, %s2212_s11 }
  0xff   : > { %1801 = vmatpush3.bf16.msra.mxu0 %v1983_v25 }
 0x100   : > { %1802 = vmatprep.subr.bf16.mxu0 %v2300_v0  ;;  %s2976_s26 = smov %s2975_s29  ;;  %s2854_s19 = scalar_lea.hbm %s2975_s29, %s1748_s13 }
 0x101   : > { %p2209_p4 = pnand %p2208_p2, %p2977_p6 }
 0x103   : > { %1803 = vmatpush3.bf16.msra.mxu0 %v1984_v26  ;;  %p2210_p3 = pneg %p2209_p4 }
 0x104   : > { %1814 = vmatprep.subr.bf16.mxu0 %v2300_v0 }
 0x106   : > { %1805 = vmatmul.mubr.msk.bf16.vlgmr.msra.gmra.mrb[4].mxu0 %vm660_vm1, %v772_v28 }
 0x107   : > { %1816 = vmatprep.mubr.msk.bf16.mxu0 %vm2301_vm0, %v2300_v0 }
 0x1d0   : > { %v766_v11 = vpop.f32.mrb[0].mxu1  ;;  %v698_v14 = vpop.f32.mrb[0].mxu0 }
 0x1d1   : > { %v767_v12 = vadd.f32 %v1724_v9, %v766_v11  ;;  %v1798_v13 = vpop.f32.mrb[1].mxu1  ;;  %v699_v16 = vadd.f32 %v1720_v10, %v698_v14  ;;  %v1790_v17 = vpop.f32.mrb[1].mxu0  ;;  %v1075_v9 = vsel %vm912_vm3, %v844_v8, 0  ;;  %v843_v14 = vld [vmem:[%s2970_s21] sm:$0xf] }
 0x1d2   : > { %v769_v15 = vpop.f32.mrb[2].mxu1  ;;  %v701_v20 = vpop.f32.mrb[2].mxu0  ;;  %v1121_v17 = vsel %vm912_vm3, %v843_v14, 0 }
 0x1d3   : > { %v2722_v18 = vpack.c.bf16 %v767_v12, %v767_v12  ;;  %v1799_v19 = vpop.f32.mrb[3].mxu1  ;;  %v704_v21 = vmul.f32 0.35355338, %v699_v16  ;;  %v1791_v22 = vpop.f32.mrb[3].mxu0 }
 0x1d5   : > { %961 = vrot.lane.b32.xlu0 %v2722_v18, %s2302_s27  ;;  %v855_v23 = vsel %vm850_vm2, %v2722_v18, 0  ;;  %v2728_v24 = vpack.c.bf16 %v704_v21, %v704_v21 }
 0x1d6   : > { %1809 = vmatpush3.bf16.xpose.msra.mxu1 %v855_v23 }
 0x1d7   : > { %1820 = vmatprep.subr.bf16.mxu1 %v2300_v0 }
 0x1d9   : > { %958 = vrot.lane.b32.xlu0 %v2728_v24, %s2302_s27  ;;  %v833_v51 = vpop.f32.mrb[4].mxu0 }
 0x1da   : > { %v1806_v52 = vpop.f32.mrb[5].mxu0  ;;  %v834_v58 = vadd.f32 %v1728_v57, %v833_v51 }
 0x1db   : > { %v836_v53 = vpop.f32.mrb[6].mxu0 }
 0x1dc   : > { %v1807_v54 = vpop.f32.mrb[7].mxu0  ;;  %v2757_v59 = vpack.c.bf16 %v834_v58, %v834_v58 }
 0x1dd   : > { %1811 = vmatmul.mubr.msk.bf16.vlgmr.msra.gmra.mrb[4].mxu1 %vm850_vm2, %v2728_v24 }
 0x1de   : > { %1822 = vmatprep.mubr.msk.bf16.mxu1 %vm2301_vm0, %v2300_v0  ;;  %v914_v60 = vsel %vm912_vm3, %v2757_v59, 0 }
 0x1df   : > { %1815 = vmatpush3.bf16.msra.mxu0 %v914_v60 }
 0x1e0   : > { %1826 = vmatprep.subr.bf16.mxu0 %v2300_v0 }
 0x247   : > { %v962_v29 = vpop.permute.xlu0 %961 }
 0x248   : > { %v967_v30 = vsel %vm850_vm2, %v962_v29, 0 }
 0x249   : > { %1821 = vmatpush3.bf16.xpose.msra.mxu1 %v967_v30 }
 0x24a   : > { %1832 = vmatprep.subr.bf16.mxu1 %v2300_v0 }
 0x24b   : > { %v959_v31 = vpop.permute.xlu0 %958 }
 0x250   : > { %1823 = vmatmul.mubr.msk.bf16.vlgmr.msra.gmra.mrb[8].mxu1 %vm850_vm2, %v959_v31 }
 0x251   : > { %1834 = vmatprep.mubr.msk.bf16.mxu1 %vm2301_vm0, %v2300_v0  ;;  %1833 = vmatpush3.bf16.msra.mxu1 %v1075_v9 }
 0x252   : > { %1844 = vmatprep.subr.bf16.mxu1 %v2300_v0 }
 0x2b0   : > { %v891_v36 = vpop.f32.mrb[4].mxu1 }
 0x2b1   : > { %v892_v37 = vadd.f32 %v891_v36, %v2750_v35  ;;  %v1812_v38 = vpop.f32.mrb[5].mxu1 }
 0x2b2   : > { %v894_v39 = vpop.f32.mrb[6].mxu1 }
 0x2b3   : > { %v1813_v40 = vpop.f32.mrb[7].mxu1  ;;  %v897_v41 = vsel %vm850_vm2, %v892_v37, -inf }
 0x2b4   : > { %898 = vmax.xlane.f32.xlu1 %v897_v41 }
 0x323   : > { %v1003_v42 = vpop.f32.mrb[8].mxu1 }
 0x324   : > { %v1004_v43 = vadd.f32 %v1003_v42, %v2750_v35  ;;  %v1824_v44 = vpop.f32.mrb[9].mxu1 }
 0x325   : > { %v1006_v45 = vpop.f32.mrb[10].mxu1 }
 0x326   : > { %v1825_v46 = vpop.f32.mrb[11].mxu1  ;;  %v1009_v47 = vsel %vm850_vm2, %v1004_v43, -inf }
 0x327   : > { %1010 = vmax.xlane.f32.xlu1 %v1009_v47 }
 0x341   : > { %v899_v48 = vpop.xlane.xlu1 %898 }
 0x342   : > { %v900_v49 = vsub.f32 %v892_v37, %v899_v48 }
 0x344   : > { %v901_v50 = vmul.f32 1.442695, %v900_v49 }
 0x346   : > { %1985 = vpow2.f32 %v901_v50 }
 0x350   : > { %v1986_v55 = vpop.eup %1985 }
 0x351   : > { %v903_v56 = vsel %vm850_vm2, %v1986_v55, 0.0 }
 0x352   : > { %904 = vadd.xlane.f32.xlu0 %v903_v56 }
 0x368   : > { %1225 = vrot.lane.b32.xlu0 %v2757_v59, %s2303_s15 }
 0x3b4   : > { %v1011_v61 = vpop.xlane.xlu1 %1010 }
 0x3b5   : > { %v1012_v62 = vsub.f32 %v1004_v43, %v1011_v61 }
 0x3b7   : > { %v1013_v63 = vmul.f32 1.442695, %v1012_v62 }
 0x3b9   : > { %1987 = vpow2.f32 %v1013_v63 }
 0x3c3   : > { %v1988_v1 = vpop.eup %1987 }
 0x3c4   : > { %v1015_v2 = vsel %vm850_vm2, %v1988_v1, 0.0 }
 0x3c5   : > { %1016 = vadd.xlane.f32.xlu1 %v1015_v2 }
 0x3d6   : > { %1022 = vrot.lane.b32.xlu1 %v2757_v59, %s2302_s27 }
 0x3da   : > { %1165 = vrot.lane.b32.xlu1 %v2722_v18, %s2303_s15 }
 0x3de   : > { %1163 = vrot.lane.b32.xlu1 %v2728_v24, %s2303_s15 }
 0x3df   : > { %v905_v3 = vpop.xlane.xlu0 %904 }
 0x3e0   : > { %1989 = vrcp.f32 %v905_v3 }
 0x3e3   : > { %v1226_v19 = vpop.permute.xlu0 %1225 }
 0x3e4   : > { %v1231_v25 = vsel %vm912_vm3, %v1226_v19, 0 }
 0x3ea   : > { %v1990_v4 = vpop.eup %1989 }
 0x3eb   : > { %v907_v5 = vmul.f32 %v1990_v4, %v1986_v55 }
 0x3ed   : > { %v908_v7 = vpack.c.bf16 %v907_v5, %v907_v5 }
 0x3ef   : > { %1817 = vmatmul.mubr.msk.bf16.vlgmr.msra.gmra.mrb[8].mxu0 %vm850_vm2, %v908_v7 }
 0x3f0   : > { %1828 = vmatprep.mubr.msk.bf16.mxu0 %vm2301_vm0, %v2300_v0 }
 0x452   : > { %v1017_v10 = vpop.xlane.xlu1 %1016 }
 0x453   : > { %1991 = vrcp.f32 %v1017_v10 }
 0x456   : > { %v1023_v11 = vpop.permute.xlu1 %1022 }
 0x457   : > { %v1028_v12 = vsel %vm912_vm3, %v1023_v11, 0 }
 0x458   : > { %1827 = vmatpush3.bf16.msra.mxu0 %v1028_v12 }
 0x459   : > { %1838 = vmatprep.subr.bf16.mxu0 %v2300_v0 }
 0x45a   : > { %v1166_v27 = vpop.permute.xlu1 %1165 }
 0x45b   : > { %v1171_v32 = vsel %vm850_vm2, %v1166_v27, 0 }
 0x45d   : > { %v1992_v13 = vpop.eup %1991 }
 0x45e   : > { %v1019_v15 = vmul.f32 %v1992_v13, %v1988_v1  ;;  %v1164_v34 = vpop.permute.xlu1 %1163 }
 0x460   : > { %v1020_v16 = vpack.c.bf16 %v1019_v15, %v1019_v15 }
 0x462   : > { %1829 = vmatmul.mubr.msk.bf16.vlgmr.msra.gmra.mrb[12].mxu0 %vm850_vm2, %v1020_v16 }
 0x463   : > { %1839 = vmatpush3.bf16.msra.mxu0 %v1121_v17  ;;  %1840 = vmatprep.mubr.msk.bf16.mxu0 %vm2301_vm0, %v2300_v0 }
 0x464   : > { %1850 = vmatprep.subr.bf16.mxu0 %v2300_v0 }
 0x4c2   : > { %v950_v20 = vpop.f32.mrb[8].mxu0 }
 0x4c3   : > { %v956_v21 = vpack.c.bf16 %v950_v20, %v950_v20  ;;  %v1818_v22 = vpop.f32.mrb[9].mxu0 }
 0x4c4   : > { %v953_v23 = vpop.f32.mrb[10].mxu0 }
 0x4c5   : > { %v1819_v26 = vpop.f32.mrb[11].mxu0  ;;  %1841 = vmatmul.mubr.msk.bf16.vlgmr.msra.gmra.mrb[16].mxu0 %vm850_vm2, %v956_v21 }
 0x4c6   : > { %1851 = vmatpush3.bf16.msra.mxu0 %v1231_v25  ;;  %1852 = vmatprep.mubr.msk.bf16.mxu0 %vm2301_vm0, %v2300_v0 }
 0x4c7   : > { %1862 = vmatprep.subr.bf16.mxu0 %v2300_v0 }
 0x535   : > { %v1064_v28 = vpop.f32.mrb[12].mxu0 }
 0x536   : > { %v1070_v29 = vpack.c.bf16 %v1064_v28, %v1064_v28  ;;  %v1830_v30 = vpop.f32.mrb[13].mxu0 }
 0x537   : > { %v1067_v31 = vpop.f32.mrb[14].mxu0 }
 0x538   : > { %v1831_v33 = vpop.f32.mrb[15].mxu0  ;;  %1835 = vmatmul.mubr.msk.bf16.vlgmr.msra.gmra.mrb[12].mxu1 %vm850_vm2, %v1070_v29 }
 0x539   : > { %1845 = vmatpush3.bf16.xpose.msra.mxu1 %v1171_v32  ;;  %1846 = vmatprep.mubr.msk.bf16.mxu1 %vm2301_vm0, %v2300_v0 }
 0x53a   : > { %1856 = vmatprep.subr.bf16.mxu1 %v2300_v0 }
 0x540   : > { %1847 = vmatmul.mubr.msk.bf16.vlgmr.msra.gmra.mrb[16].mxu1 %vm850_vm2, %v1164_v34 }
 0x541   : > { %1858 = vmatprep.mubr.msk.bf16.mxu1 %vm2301_vm0, %v2300_v0 }
 0x598   : > { %v1157_v36 = vpop.f32.mrb[16].mxu0 }
 0x599   : > { %v1842_v37 = vpop.f32.mrb[17].mxu0 }
 0x59a   : > { %v1160_v38 = vpop.f32.mrb[18].mxu0  ;;  %v1744_v37 = vld [vmem:[%s2971_s1] ss:$0 sm:$0xff]  ;;  %s2213_s1 = scalar_lea.vmem %s2212_s11, 256 }
 0x59b   : > { %v1843_v39 = vpop.f32.mrb[19].mxu0  ;;  %p2215_p8 = scmp.lt.s32.totalorder %s2213_s1, %s2207_s12 }
 0x59d   : > { %p2216_p1 = por %p2215_p8, %p2214_p9 }
 0x59f   : > { %p2217_p11 = pnand %p2216_p1, %p2210_p3 }
 0x60b   : > { %v1111_v40 = vpop.f32.mrb[12].mxu1 }
 0x60c   : > { %v2799_v41 = vadd.f32 %v1157_v36, %v1111_v40  ;;  %v1836_v42 = vpop.f32.mrb[13].mxu1 }
 0x60d   : > { %v1114_v43 = vpop.f32.mrb[14].mxu1 }
 0x60e   : > { %v1837_v44 = vpop.f32.mrb[15].mxu1 }
 0x613   : > { %v1207_v45 = vpop.f32.mrb[16].mxu1 }
 0x614   : > { %v1208_v46 = vadd.f32 %v1207_v45, %v2750_v35  ;;  %v1848_v47 = vpop.f32.mrb[17].mxu1 }
 0x615   : > { %v1210_v48 = vpop.f32.mrb[18].mxu1 }
 0x616   : > { %v1849_v49 = vpop.f32.mrb[19].mxu1  ;;  %v1213_v50 = vsel %vm850_vm2, %v1208_v46, -inf }
 0x617   : > { %1214 = vmax.xlane.f32.xlu1 %v1213_v50 }
 0x6a4   : > { %v1215_v51 = vpop.xlane.xlu1 %1214 }
 0x6a5   : > { %v1216_v52 = vsub.f32 %v1208_v46, %v1215_v51 }
 0x6a7   : > { %v1217_v53 = vmul.f32 1.442695, %v1216_v52 }
 0x6a9   : > { %1993 = vpow2.f32 %v1217_v53 }
 0x6b3   : > { %v1994_v54 = vpop.eup %1993 }
 0x6b4   : > { %v1219_v55 = vsel %vm850_vm2, %v1994_v54, 0.0 }
 0x6b5   : > { %1220 = vadd.xlane.f32.xlu0 %v1219_v55  ;;  %v1746_v55 = vld [vmem:[%s2974_s14] ss:$0 sm:$0xff] }
 0x6cb   : > { %1323 = vrot.lane.b32.xlu0 %v2722_v18, %s2304_s10 }
 0x6cf   : > { %1321 = vrot.lane.b32.xlu0 %v2728_v24, %s2304_s10  ;;  %v845_v24 = vld [vmem:[%s2970_s21 + $0x8] sm:$0xf] }
 0x6d0   : > { %v1278_v63 = vsel %vm912_vm3, %v845_v24, 0 }
 0x6d1   : > { %1857 = vmatpush3.bf16.msra.mxu1 %v1278_v63 }
 0x6d2   : > { %1868 = vmatprep.subr.bf16.mxu1 %v2300_v0 }
 0x742   : > { %v1221_v56 = vpop.xlane.xlu0 %1220 }
 0x743   : > { %1995 = vrcp.f32 %v1221_v56 }
 0x746   : > { %v1324_v60 = vpop.permute.xlu0 %1323 }
 0x747   : > { %v1329_v62 = vsel %vm850_vm2, %v1324_v60, 0 }
 0x74a   : > { %v1322_v18 = vpop.permute.xlu0 %1321 }
 0x74d   : > { %v1996_v57 = vpop.eup %1995 }
 0x74e   : > { %v1223_v58 = vmul.f32 %v1996_v57, %v1994_v54 }
 0x750   : > { %v1224_v61 = vpack.c.bf16 %v1223_v58, %v1223_v58 }
 0x752   : > { %1853 = vmatmul.mubr.msk.bf16.vlgmr.msra.gmra.mrb[20].mxu0 %vm850_vm2, %v1224_v61 }
 0x753   : > { %1863 = vmatpush3.bf16.xpose.msra.mxu0 %v1329_v62  ;;  %1864 = vmatprep.mubr.msk.bf16.mxu0 %vm2301_vm0, %v2300_v0 }
 0x754   : > { %1874 = vmatprep.subr.bf16.mxu0 %v2300_v0 }
 0x75a   : > { %1865 = vmatmul.mubr.msk.bf16.vlgmr.msra.gmra.mrb[24].mxu0 %vm850_vm2, %v1322_v18 }
 0x75b   : > { %1876 = vmatprep.mubr.msk.bf16.mxu0 %vm2301_vm0, %v2300_v0 }
 0x825   : > { %v1267_v1 = vpop.f32.mrb[20].mxu0 }
 0x826   : > { %v1273_v2 = vpack.c.bf16 %v1267_v1, %v1267_v1  ;;  %v1854_v3 = vpop.f32.mrb[21].mxu0 }
 0x827   : > { %v1270_v4 = vpop.f32.mrb[22].mxu0 }
 0x828   : > { %v1855_v5 = vpop.f32.mrb[23].mxu0  ;;  %1859 = vmatmul.mubr.msk.bf16.vlgmr.msra.gmra.mrb[20].mxu1 %vm850_vm2, %v1273_v2 }
 0x829   : > { %1870 = vmatprep.mubr.msk.bf16.mxu1 %vm2301_vm0, %v2300_v0  ;;  %v846_v0 = vld [vmem:[%s2970_s21 + $0xc] sm:$0xf] }
 0x82d   : > { %v1365_v7 = vpop.f32.mrb[24].mxu0 }
 0x82e   : > { %v1366_v8 = vadd.f32 %v1365_v7, %v2750_v35  ;;  %v1866_v9 = vpop.f32.mrb[25].mxu0  ;;  %v1436_v35 = vsel %vm912_vm3, %v846_v0, 0 }
 0x82f   : > { %v1368_v10 = vpop.f32.mrb[26].mxu0  ;;  %1875 = vmatpush3.bf16.msra.mxu0 %v1436_v35 }
 0x830   : > { %v1867_v11 = vpop.f32.mrb[27].mxu0  ;;  %v1371_v12 = vsel %vm850_vm2, %v1366_v8, -inf }
 0x831   : > { %1372 = vmax.xlane.f32.xlu0 %v1371_v12 }
 0x8be   : > { %v1373_v13 = vpop.xlane.xlu0 %1372 }
 0x8bf   : > { %v1374_v14 = vsub.f32 %v1366_v8, %v1373_v13 }
 0x8c1   : > { %v1375_v15 = vmul.f32 1.442695, %v1374_v14 }
 0x8c3   : > { %1997 = vpow2.f32 %v1375_v15 }
 0x8cd   : > { %v1998_v16 = vpop.eup %1997 }
 0x8ce   : > { %v1377_v17 = vsel %vm850_vm2, %v1998_v16, 0.0 }
 0x8cf   : > { %1378 = vadd.xlane.f32.xlu1 %v1377_v17 }
 0x8e0   : > { %1383 = vrot.lane.b32.xlu1 %v2757_v59, %s2304_s10 }
 0x8fb   : > { %v1314_v19 = vpop.f32.mrb[20].mxu1 }
 0x8fc   : > { %v1320_v20 = vadd.f32 %v1314_v19, %v2799_v41  ;;  %v1860_v21 = vpop.f32.mrb[21].mxu1 }
 0x8fd   : > { %v1317_v22 = vpop.f32.mrb[22].mxu1 }
 0x8fe   : > { %v1861_v23 = vpop.f32.mrb[23].mxu1 }
 0x95c   : > { %v1379_v25 = vpop.xlane.xlu1 %1378 }
 0x95d   : > { %1999 = vrcp.f32 %v1379_v25 }
 0x960   : > { %v1384_v26 = vpop.permute.xlu1 %1383 }
 0x961   : > { %v1389_v27 = vsel %vm912_vm3, %v1384_v26, 0 }
 0x962   : > { %1869 = vmatpush3.bf16.msra.mxu1 %v1389_v27 }
 0x967   : > { %v2000_v59 = vpop.eup %1999 }
 0x968   : > { %v1381_v28 = vmul.f32 %v2000_v59, %v1998_v16 }
 0x96a   : > { %v1382_v29 = vpack.c.bf16 %v1381_v28, %v1381_v28 }
 0x96c   : > { %1871 = vmatmul.mubr.msk.bf16.vlgmr.msra.gmra.mrb[24].mxu1 %vm850_vm2, %v1382_v29 }
 0xa3f   : > { %v1425_v30 = vpop.f32.mrb[24].mxu1 }
 0xa40   : > { %v1431_v31 = vpack.c.bf16 %v1425_v30, %v1425_v30  ;;  %v1872_v32 = vpop.f32.mrb[25].mxu1 }
 0xa41   : > { %v1428_v33 = vpop.f32.mrb[26].mxu1 }
 0xa42   : > { %v1873_v34 = vpop.f32.mrb[27].mxu1  ;;  %1877 = vmatmul.mubr.msk.bf16.vlgmr.msra.gmra.mrb[28].mxu0 %vm850_vm2, %v1431_v31 }
 0xb15   : > { %v1472_v36 = vpop.f32.mrb[28].mxu0 }
 0xb16   : > { %v1478_v38 = vadd.f32 %v1472_v36, %v1320_v20  ;;  %v1878_v39 = vpop.f32.mrb[29].mxu0 }
 0xb17   : > { %v1475_v40 = vpop.f32.mrb[30].mxu0 }
 0xb18   : > { %v1486_v41 = vadd.f32 %v1744_v37, %v1478_v38  ;;  %v1879_v42 = vpop.f32.mrb[31].mxu0 }
 0xb1a   : > { %v1487_v43 = vadd.f32 %v1486_v41, %v2704_v6  ;;  %v1745_v6 = vld [vmem:[%s2973_s23] ss:$0 sm:$0xff] }
 0xb1c   : > { %v1488_v44 = vsel %vm660_vm1, %v1487_v43, 0.0 }
 0xb1d   : > { %1489 = vadd.xlane.f32.xlu1 %v1488_v44 }
 0xbaa   : > { %v1490_v45 = vpop.xlane.xlu1 %1489 }
 0xbab   : > { %v1492_v46 = vmul.f32 0.03125, %v1490_v45 }
 0xbad   : > { %v1493_v47 = vsub.f32 %v1487_v43, %v1492_v46 }
 0xbaf   : > { %v1494_v48 = vmul.f32 %v1493_v47, %v1493_v47 }
 0xbb1   : > { %v1495_v49 = vsel %vm660_vm1, %v1494_v48, 0.0 }
 0xbb2   : > { %1496 = vadd.xlane.f32.xlu0 %v1495_v49 }
 0xc3f   : > { %v1497_v50 = vpop.xlane.xlu0 %1496 }
 0xc40   : > { %v1498_v51 = vmul.f32 0.03125, %v1497_v50 }
 0xc42   : > { %v1499_v52 = vadd.f32 1e-05, %v1498_v51 }
 0xc44   : > { %2001 = vrsqrt.f32 %v1499_v52 }
 0xc4e   : > { %v2002_v53 = vpop.eup %2001 }
 0xc4f   : > { %v1501_v54 = vmul.f32 %v2002_v53, %v1493_v47 }
 0xc51   : > { %v1509_v56 = vmul.f32 %v1745_v6, %v1501_v54 }
 0xc53   : > { %v1517_v57 = vadd.f32 %v1746_v55, %v1509_v56 }
 0xc55   : > { %1518 = vst.msk [vmem:[%s631_s20] sm:$0xff] %vm660_vm1, %v1517_v57 }
 0xc56   : > { %2220 = shalt.err (!%p2217_p11)
}
 0xc57   : > { %s2221_s18 = scalar_lea.hbm %s2854_s19, 128  ;;  %s2225_s23 = scalar_lea.hbm %s2976_s26, 512 }
 0xc58   : > { %p2222_p7 = scmp.ne.s32.totalorder %s2854_s19, %s2221_s18  ;;  %p2226_p10 = scmp.lt.u32.totalorder %s2854_s19, %s2976_s26 }
 0xc59   : > { %p2227_p0 = scmp.lt.u32.totalorder %s2225_s23, %s2221_s18  ;;  %p2229_p2 = scmp.lt.u32.totalorder %s2221_s18, %s2854_s19 }
 0xc5a   : > { %p2223_p5 = pnand %p2222_p7, %p2977_p6 }
 0xc5b   : > { %p2228_p12 = por %p2227_p0, %p2226_p10 }
 0xc5c   : > { %p2224_p13 = pneg %p2223_p5 }
 0xc5d   : > { %p2230_p4 = por %p2229_p2, %p2228_p12 }
 0xc5f   : > { %p2231_p3 = pnand %p2230_p4, %p2224_p13 }
 0xc61   : > { %2234 = shalt.err (!%p2231_p3)
}
 0xc62   : > { %1900 = dma.vmem_to_hbm [thread:$0]  (%p2977_p6), %s2856_s8, 128, %s2854_s19, %s1520_s4  }
 0xc63 PF: > { %s2978_s14 = sld [smem:[#allocation21_spill]]  ;;  %s2979_s13 = sld [smem:[#allocation23_spill]] }
 0xc64   : > { %p1936_p9 = scmp.ge.s32.totalorder %s2289_s16, 2 }
 0xc69   : > { %s1545_s20 = sand.u32 1, %s2978_s14   ;;  %p2980_p8 = scmp.ne.s32.totalorder %s2979_s13, 0 }
 0xc6a   : > { %s1546_s10 = scalar_lea.sflag [#allocation4], %s1545_s20 }
 0xc6b   : > { %p1926_p1 = pnand %p1936_p9, %p2980_p8 }
 0xc6d   : > { %2272 = dma.done.wait (!%p1926_p1), %s1546_s10, 128  }
 0xc6e   : > { %2274 = vsyncadd (!%p1926_p1), %s1546_s10, 4294967168  ;;  %s2981_s16 = sld [smem:[#allocation24_spill]]  ;;  %s2982_s24 = sld [smem:[#allocation22_spill]] }
 0xc6f   : > { %s2983_s15 = sld [smem:[#allocation26_spill]]  ;;  %s2984_s29 = smov %s2281_s30 }
 0xc74   : > { %p34_p11 = scmp.ge.s32.totalorder %s2981_s16, 6   ;;  %s2985_s30 = smov %s2982_s24 }
 0xc76   :  { %36 = sbr.rel (!%p34_p11) target bundleno = 19 (0x13), region = 170 }
 0xc7d   :  { %1551 = vsyncpa [#allocation3], 1 }
 0xc7e   :  { %1553 = vsyncpa [#allocation3 + $0x1], 1 }
 0xc7f   :  { %1554 = vsyncpa [#allocation6], 1 }
 0xc80   :  { %1556 = vsyncpa [#allocation6 + $0x1], 1 }
 0xc81   :  { %1557 = vsyncpa [#allocation9], 1 }
 0xc82   :  { %1559 = vsyncpa [#allocation9 + $0x1], 1 }
 0xc83   :  { %1560 = vsyncpa [#allocation12], 1 }
 0xc84   :  { %1561 = vsyncpa [#allocation4], 1 }
 0xc85   :  { %1563 = vsyncpa [#allocation4 + $0x1], 1 }

</bundles_post_ra>
